<compile_context>
chip_gen: v7x
topology: tpu7x:2x2x1
jax: 0.10.0
libtpu: 0.0.40
codegen_flags: <defaults>
</compile_context>

<pallas_src>
import math

import jax
import jax.numpy as jnp
from jax.experimental import pallas as pl
from jax.experimental.pallas import tpu as pltpu

_EPS = 1e-5


def _round_up(x, m):
    return ((x + m - 1) // m) * m


# ---------------------------------------------------------------------------
# Weight preparation (host side, tiny)
# ---------------------------------------------------------------------------
def _fold_bn(w, bn_stats, conv_bias=None, eps=_EPS):
    """Fold inference-mode BatchNorm into the preceding conv (weight last dim = Cout)."""
    gamma, beta, mean, var = bn_stats
    scale = gamma / jnp.sqrt(var + eps)
    wf = w * scale
    if conv_bias is None:
        bf = beta - mean * scale
    else:
        bf = (conv_bias - mean) * scale + beta
    return wf, bf


def _pack_conv3x3(w_hwio, b, cin_p, cout_p):
    """(3,3,Cin,Cout) folded conv -> (cout_p, 9*cin_p) packed matrix + (cout_p,1) bias.

    Row order of the packed K dim is (kh, kw, cin), matching the im2col slab the
    kernel builds (tap-major, channel-minor).  Padding channels are zeros.
    """
    _, _, cin, cout = w_hwio.shape
    w = jnp.pad(w_hwio, ((0, 0), (0, 0), (0, cin_p - cin), (0, cout_p - cout)))
    wp = w.reshape(9 * cin_p, cout_p).T                      # (cout_p, 9*cin_p)
    bp = jnp.pad(b, (0, cout_p - cout)).reshape(cout_p, 1)
    return wp, bp


def _conv_masks(H, W, dil):
    """(9, H*W) validity mask per 3x3 tap for 'same' dilated conv (pad == dil)."""
    idx = jnp.arange(H * W)
    hh = idx // W
    ww = idx % W
    rows = []
    for kh in range(3):
        for kw in range(3):
            dh = (kh - 1) * dil
            dw = (kw - 1) * dil
            valid = ((hh + dh >= 0) & (hh + dh < H) &
                     (ww + dw >= 0) & (ww + dw < W))
            rows.append(valid.astype(jnp.float32))
    return jnp.stack(rows)


# ---------------------------------------------------------------------------
# Fused Pallas kernel
# ---------------------------------------------------------------------------
def _make_kernel(H, W, cout):
    HW = H * W
    f32 = jnp.float32

    def conv3x3(x, wp, bp, mask, dil):
        """x: (cin, HW);  wp: (cout, 9*cin);  mask: (9, HW).  Returns relu(conv)."""
        taps = []
        for kh in range(3):
            for kw in range(3):
                s = ((kh - 1) * W + (kw - 1)) * dil          # flat input offset
                if s == 0:                                   # center tap: no shift/mask
                    taps.append(x)
                else:
                    t = kh * 3 + kw
                    rolled = pltpu.roll(x, shift=(-s) % HW, axis=1)
                    taps.append(rolled * mask[t:t + 1, :])
        slab = jnp.concatenate(taps, axis=0)                 # (9*cin, HW) im2col
        y = jnp.dot(wp, slab, preferred_element_type=f32) + bp
        return jnp.maximum(y, 0.0)

    def kernel(x_ref, m2_ref, m1_ref, p_ref, eh_ref, ew_ref,
               w1_ref, b1_ref, w2_ref, b2_ref, w3_ref, b3_ref,
               w4_ref, b4_ref, cw1_ref, cb1_ref,
               cwh_ref, cbh_ref, cww_ref, cbw_ref, o_ref):
        x = x_ref[...]                                       # (cin_p, HW)
        m2 = m2_ref[...]                                     # (9, HW) masks dil=2
        m1 = m1_ref[...]                                     # (9, HW) masks dil=1

        # conv1/bn1/relu -> conv2/bn2/relu -> conv3/bn3/relu  (all VMEM resident)
        y = conv3x3(x, w1_ref[...], b1_ref[...], m2, 2)      # (cp, HW)
        y = conv3x3(y, w2_ref[...], b2_ref[...], m2, 2)
        y = conv3x3(y, w3_ref[...], b3_ref[...], m1, 1)

        # conv4 (1x1) + bn4, no activation
        y = jnp.dot(w4_ref[...], y, preferred_element_type=f32) + b4_ref[...]  # (cout, HW)

        # CoordAtt: one matmul computes both directional average pools.
        pooled = jnp.dot(y, p_ref[...], preferred_element_type=f32)      # (cout, H+W)
        t = jnp.dot(cw1_ref[...], pooled,
                    preferred_element_type=f32) + cb1_ref[...]           # (mip, H+W)
        t = t * jnp.clip(t + 3.0, 0.0, 6.0) * (1.0 / 6.0)                # h_swish
        a_h = jax.nn.sigmoid(
            jnp.dot(cwh_ref[...], t[:, :H],
                    preferred_element_type=f32) + cbh_ref[...])          # (cout, H)
        a_w = jax.nn.sigmoid(
            jnp.dot(cww_ref[...], t[:, H:],
                    preferred_element_type=f32) + cbw_ref[...])          # (cout, W)
        # Broadcast the gates back onto (cout, HW) with constant 0/1 matmuls
        # (keeps the lane-dense layout, no reshapes).
        gate = (jnp.dot(a_h, eh_ref[...], preferred_element_type=f32) *
                jnp.dot(a_w, ew_ref[...], preferred_element_type=f32))   # (cout, HW)

        res = x[:cout, :]                                    # residual (inplanes == cout)
        o_ref[...] = jnp.maximum(y * gate + res, 0.0)

    return kernel


# ---------------------------------------------------------------------------
# Wrapper
# ---------------------------------------------------------------------------
def bottleneck_forward(x_nchw, params):
    """Bottleneck forward. x: (B, C_in, H, W) f32 (NCHW, like PyTorch). Returns NCHW."""
    B, inplanes, H, W = x_nchw.shape
    HW = H * W
    f32 = jnp.float32
    planes = params["conv1_w"].shape[-1]
    cout = params["conv4_w"].shape[-1]
    mip = params["ca_w1"].shape[-1]
    assert inplanes == cout, "residual add requires inplanes == planes*expansion"

    cin_p = _round_up(inplanes, 8)     # pad channel counts to sublane-tile multiples
    cp = _round_up(planes, 8)

    x = x_nchw.reshape(B, inplanes, HW).astype(f32)          # free reshape, no transpose
    if cin_p != inplanes:
        x = jnp.pad(x, ((0, 0), (0, cin_p - inplanes), (0, 0)))

    # Fold BN into each conv, then pack for the (C, HW) compute layout.
    w1, b1 = _fold_bn(params["conv1_w"], params["bn1"])
    w2, b2 = _fold_bn(params["conv2_w"], params["bn2"])
    w3, b3 = _fold_bn(params["conv3_w"], params["bn3"])
    w4, b4 = _fold_bn(params["conv4_w"], params["bn4"])
    cw1, cb1 = _fold_bn(params["ca_w1"], params["ca_bn1"], conv_bias=params["ca_b1"])

    w1p, b1p = _pack_conv3x3(w1, b1, cin_p, cp)              # (cp, 9*cin_p)
    w2p, b2p = _pack_conv3x3(w2, b2, cp, cp)                 # (cp, 9*cp)
    w3p, b3p = _pack_conv3x3(w3, b3, cp, cp)
    w4p = jnp.pad(w4, ((0, cp - planes), (0, 0))).T          # (cout, cp)
    b4p = b4.reshape(cout, 1)
    cw1p = cw1.T                                             # (mip, cout)
    cb1p = cb1.reshape(mip, 1)
    cwhp = params["ca_wh"].T                                 # (cout, mip)
    cbhp = params["ca_bh"].reshape(cout, 1)
    cwwp = params["ca_ww"].T
    cbwp = params["ca_bw"].reshape(cout, 1)

    # Constant helper matrices (tiny, VMEM-resident across grid steps).
    mask2 = _conv_masks(H, W, 2)                             # (9, HW)
    mask1 = _conv_masks(H, W, 1)                             # (9, HW)
    idx = jnp.arange(HW)
    hh = idx // W
    ww = idx % W
    pool = jnp.concatenate(
        [(hh[:, None] == jnp.arange(H)[None, :]).astype(f32) / W,    # avg over W
         (ww[:, None] == jnp.arange(W)[None, :]).astype(f32) / H],   # avg over H
        axis=1)                                              # (HW, H+W)
    e_h = (jnp.arange(H)[:, None] == hh[None, :]).astype(f32)        # (H, HW)
    e_w = (jnp.arange(W)[:, None] == ww[None, :]).astype(f32)        # (W, HW)

    kernel = _make_kernel(H, W, cout)
    const2 = lambda b: (0, 0)

    out = pl.pallas_call(
        kernel,
        out_shape=jax.ShapeDtypeStruct((B, cout, HW), f32),
        grid=(B,),
        in_specs=[
            pl.BlockSpec((None, cin_p, HW), lambda b: (b, 0, 0)),     # x (batch-squeezed)
            pl.BlockSpec((9, HW), const2),                            # mask dil=2
            pl.BlockSpec((9, HW), const2),                            # mask dil=1
            pl.BlockSpec((HW, H + W), const2),                        # pooling matrix
            pl.BlockSpec((H, HW), const2),                            # h-gate broadcast
            pl.BlockSpec((W, HW), const2),                            # w-gate broadcast
            pl.BlockSpec((cp, 9 * cin_p), const2),                    # conv1 packed
            pl.BlockSpec((cp, 1), const2),
            pl.BlockSpec((cp, 9 * cp), const2),                       # conv2 packed
            pl.BlockSpec((cp, 1), const2),
            pl.BlockSpec((cp, 9 * cp), const2),                       # conv3 packed
            pl.BlockSpec((cp, 1), const2),
            pl.BlockSpec((cout, cp), const2),                         # conv4
            pl.BlockSpec((cout, 1), const2),
            pl.BlockSpec((mip, cout), const2),                        # CoordAtt conv1+bn1
            pl.BlockSpec((mip, 1), const2),
            pl.BlockSpec((cout, mip), const2),                        # conv_h
            pl.BlockSpec((cout, 1), const2),
            pl.BlockSpec((cout, mip), const2),                        # conv_w
            pl.BlockSpec((cout, 1), const2),
        ],
        out_specs=pl.BlockSpec((None, cout, HW), lambda b: (b, 0, 0)),
        # Total VMEM footprint is ~1.5 MB, far under the default scoped limit on
        # all generations, so no vmem_limit_bytes override is needed.
        compiler_params=pltpu.CompilerParams(dimension_semantics=("parallel",)),
    )(x, mask2, mask1, pool, e_h, e_w,
      w1p, b1p, w2p, b2p, w3p, b3p, w4p, b4p,
      cw1p, cb1p, cwhp, cbhp, cwwp, cbwp)

    return out.reshape(B, cout, H, W)


# ---------------------------------------------------------------------------
# Synthetic parameters (deterministic) matching the PyTorch module shapes
# ---------------------------------------------------------------------------
def init_params(key, inplanes, planes, reduction=32, expansion=4):
    cout = planes * expansion
    mip = max(8, cout // reduction)
    keys = iter(jax.random.split(key, 32))

    def uw(shape, fan_in):
        bound = 1.0 / math.sqrt(fan_in)
        return jax.random.uniform(next(keys), shape, jnp.float32, -bound, bound)

    def bn(c):
        gamma = 1.0 + 0.1 * jax.random.normal(next(keys), (c,), jnp.float32)
        beta = 0.1 * jax.random.normal(next(keys), (c,), jnp.float32)
        mean = 0.1 * jax.random.normal(next(keys), (c,), jnp.float32)
        var = 0.5 + jax.random.uniform(next(keys), (c,), jnp.float32)
        return (gamma, beta, mean, var)

    p = {}
    p["conv1_w"] = uw((3, 3, inplanes, planes), 9 * inplanes)   # HWIO
    p["bn1"] = bn(planes)
    p["conv2_w"] = uw((3, 3, planes, planes), 9 * planes)
    p["bn2"] = bn(planes)
    p["conv3_w"] = uw((3, 3, planes, planes), 9 * planes)
    p["bn3"] = bn(planes)
    p["conv4_w"] = uw((planes, cout), planes)                   # 1x1 conv as matrix
    p["bn4"] = bn(cout)
    # CoordAtt(cout, cout, reduction)
    p["ca_w1"] = uw((cout, mip), cout)
    p["ca_b1"] = uw((mip,), cout)
    p["ca_bn1"] = bn(mip)
    p["ca_wh"] = uw((mip, cout), mip)
    p["ca_bh"] = uw((cout,), mip)
    p["ca_ww"] = uw((mip, cout), mip)
    p["ca_bw"] = uw((cout,), mip)
    return p


# ---------------------------------------------------------------------------
# Plain-JAX reference (conv + explicit BN, no folding) for verification
# ---------------------------------------------------------------------------
def _reference(x_nchw, p):
    hp = jax.lax.Precision.HIGHEST

    def conv(x, w, pad, dil):
        return jax.lax.conv_general_dilated(
            x, w, window_strides=(1, 1), padding=[(pad, pad), (pad, pad)],
            rhs_dilation=(dil, dil),
            dimension_numbers=("NHWC", "HWIO", "NHWC"), precision=hp)

    def bn(x, stats):
        g, b, m, v = stats
        return (x - m) / jnp.sqrt(v + _EPS) * g + b

    x = jnp.transpose(x_nchw, (0, 2, 3, 1))
    B, H, W, _ = x.shape
    out = jax.nn.relu(bn(conv(x, p["conv1_w"], 2, 2), p["bn1"]))
    out = jax.nn.relu(bn(conv(out, p["conv2_w"], 2, 2), p["bn2"]))
    out = jax.nn.relu(bn(conv(out, p["conv3_w"], 1, 1), p["bn3"]))
    out = bn(conv(out, p["conv4_w"][None, None], 0, 1), p["bn4"])

    # CoordAtt
    y = out
    xh = jnp.mean(y, axis=2)                          # (B, H, C)  pool over W
    xw = jnp.mean(y, axis=1)                          # (B, W, C)  pool over H
    cat = jnp.concatenate([xh, xw], axis=1)           # (B, H+W, C)
    t = jnp.dot(cat, p["ca_w1"], precision=hp) + p["ca_b1"]
    t = bn(t, p["ca_bn1"])
    t = t * jnp.clip(t + 3.0, 0.0, 6.0) / 6.0         # h_swish
    a_h = jax.nn.sigmoid(jnp.dot(t[:, :H], p["ca_wh"], precision=hp) + p["ca_bh"])
    a_w = jax.nn.sigmoid(jnp.dot(t[:, H:], p["ca_ww"], precision=hp) + p["ca_bw"])
    out = y * a_h[:, :, None, :] * a_w[:, None, :, :]
    out = jax.nn.relu(out + x)
    return jnp.transpose(out, (0, 3, 1, 2))


if __name__ == "__main__":
    key = jax.random.PRNGKey(0)
    kx, kp = jax.random.split(key)

    B, planes, H, W = 2, 4, 16, 16
    inplanes = planes * 4          # residual path requires matching channel count
    x = jax.random.normal(kx, (B, inplanes, H, W), dtype=jnp.float32)
    params = init_params(kp, inplanes=inplanes, planes=planes)

    out = jax.block_until_ready(bottleneck_forward(x, params))

    ref = _reference(x, params)
    assert out.shape == (B, planes * 4, H, W)
    max_err = float(jnp.max(jnp.abs(out - ref)))
    assert jnp.allclose(out, ref, atol=1e-3, rtol=1e-3), (
        f"mismatch vs reference, max abs err = {max_err}")

    print("KERNEL_OK")
</pallas_src>

<mosaic_0001>
module attributes {stable_mosaic.version = 11 : i64} {
  func.func @kernel(%arg0: i32, %arg1: memref<1x16x256xf32, #tpu.memory_space<vmem>>, %arg2: memref<9x256xf32, #tpu.memory_space<vmem>>, %arg3: memref<9x256xf32, #tpu.memory_space<vmem>>, %arg4: memref<256x32xf32, #tpu.memory_space<vmem>>, %arg5: memref<16x256xf32, #tpu.memory_space<vmem>>, %arg6: memref<16x256xf32, #tpu.memory_space<vmem>>, %arg7: memref<8x144xf32, #tpu.memory_space<vmem>>, %arg8: memref<8x1xf32, #tpu.memory_space<vmem>>, %arg9: memref<8x72xf32, #tpu.memory_space<vmem>>, %arg10: memref<8x1xf32, #tpu.memory_space<vmem>>, %arg11: memref<8x72xf32, #tpu.memory_space<vmem>>, %arg12: memref<8x1xf32, #tpu.memory_space<vmem>>, %arg13: memref<16x8xf32, #tpu.memory_space<vmem>>, %arg14: memref<16x1xf32, #tpu.memory_space<vmem>>, %arg15: memref<8x16xf32, #tpu.memory_space<vmem>>, %arg16: memref<8x1xf32, #tpu.memory_space<vmem>>, %arg17: memref<16x8xf32, #tpu.memory_space<vmem>>, %arg18: memref<16x1xf32, #tpu.memory_space<vmem>>, %arg19: memref<16x8xf32, #tpu.memory_space<vmem>>, %arg20: memref<16x1xf32, #tpu.memory_space<vmem>>, %arg21: memref<1x16x256xf32, #tpu.memory_space<vmem>>) attributes {dimension_semantics = [#tpu.dimension_semantics<parallel>], iteration_bounds = array<i64: 2>, scalar_prefetch = 0 : i64, scratch_operands = 0 : i64, tpu.core_type = #tpu.core_type<tc>, window_params = [{transform_indices = @transform_0, window_bounds = array<i64: 1, 16, 256>}, {pipeline_mode = #tpu.pipeline_mode<synchronous>, transform_indices = @transform_1, window_bounds = array<i64: 9, 256>}, {pipeline_mode = #tpu.pipeline_mode<synchronous>, transform_indices = @transform_2, window_bounds = array<i64: 9, 256>}, {pipeline_mode = #tpu.pipeline_mode<synchronous>, transform_indices = @transform_3, window_bounds = array<i64: 256, 32>}, {pipeline_mode = #tpu.pipeline_mode<synchronous>, transform_indices = @transform_4, window_bounds = array<i64: 16, 256>}, {pipeline_mode = #tpu.pipeline_mode<synchronous>, transform_indices = @transform_5, window_bounds = array<i64: 16, 256>}, {pipeline_mode = #tpu.pipeline_mode<synchronous>, transform_indices = @transform_6, window_bounds = array<i64: 8, 144>}, {pipeline_mode = #tpu.pipeline_mode<synchronous>, transform_indices = @transform_7, window_bounds = array<i64: 8, 1>}, {pipeline_mode = #tpu.pipeline_mode<synchronous>, transform_indices = @transform_8, window_bounds = array<i64: 8, 72>}, {pipeline_mode = #tpu.pipeline_mode<synchronous>, transform_indices = @transform_9, window_bounds = array<i64: 8, 1>}, {pipeline_mode = #tpu.pipeline_mode<synchronous>, transform_indices = @transform_10, window_bounds = array<i64: 8, 72>}, {pipeline_mode = #tpu.pipeline_mode<synchronous>, transform_indices = @transform_11, window_bounds = array<i64: 8, 1>}, {pipeline_mode = #tpu.pipeline_mode<synchronous>, transform_indices = @transform_12, window_bounds = array<i64: 16, 8>}, {pipeline_mode = #tpu.pipeline_mode<synchronous>, transform_indices = @transform_13, window_bounds = array<i64: 16, 1>}, {pipeline_mode = #tpu.pipeline_mode<synchronous>, transform_indices = @transform_14, window_bounds = array<i64: 8, 16>}, {pipeline_mode = #tpu.pipeline_mode<synchronous>, transform_indices = @transform_15, window_bounds = array<i64: 8, 1>}, {pipeline_mode = #tpu.pipeline_mode<synchronous>, transform_indices = @transform_16, window_bounds = array<i64: 16, 8>}, {pipeline_mode = #tpu.pipeline_mode<synchronous>, transform_indices = @transform_17, window_bounds = array<i64: 16, 1>}, {pipeline_mode = #tpu.pipeline_mode<synchronous>, transform_indices = @transform_18, window_bounds = array<i64: 16, 8>}, {pipeline_mode = #tpu.pipeline_mode<synchronous>, transform_indices = @transform_19, window_bounds = array<i64: 16, 1>}, {transform_indices = @transform_20, window_bounds = array<i64: 1, 16, 256>}]} {
    %c0 = arith.constant 0 : index
    %c0_0 = arith.constant 0 : index
    %c0_1 = arith.constant 0 : index
    %0 = vector.load %arg1[%c0, %c0_0, %c0_1] : memref<1x16x256xf32, #tpu.memory_space<vmem>>, vector<1x16x256xf32>
    %1 = vector.shape_cast %0 : vector<1x16x256xf32> to vector<16x256xf32>
    %c0_2 = arith.constant 0 : index
    %c0_3 = arith.constant 0 : index
    %2 = vector.load %arg2[%c0_2, %c0_3] : memref<9x256xf32, #tpu.memory_space<vmem>>, vector<9x256xf32>
    %c0_4 = arith.constant 0 : index
    %c0_5 = arith.constant 0 : index
    %3 = vector.load %arg3[%c0_4, %c0_5] : memref<9x256xf32, #tpu.memory_space<vmem>>, vector<9x256xf32>
    %c0_6 = arith.constant 0 : index
    %c0_7 = arith.constant 0 : index
    %4 = vector.load %arg7[%c0_6, %c0_7] : memref<8x144xf32, #tpu.memory_space<vmem>>, vector<8x144xf32>
    %c0_8 = arith.constant 0 : index
    %c0_9 = arith.constant 0 : index
    %5 = vector.load %arg8[%c0_8, %c0_9] : memref<8x1xf32, #tpu.memory_space<vmem>>, vector<8x1xf32>
    %c34_i32 = arith.constant 34 : i32
    %6 = tpu.dynamic_rotate %1 by %c34_i32 dim 1 : vector<16x256xf32>, i32 -> vector<16x256xf32>
    %7 = vector.extract_strided_slice %2 {offsets = [0, 0], sizes = [1, 256], strides = [1, 1]} : vector<9x256xf32> to vector<1x256xf32>
    %8 = vector.broadcast %7 : vector<1x256xf32> to vector<16x256xf32>
    %9 = arith.mulf %6, %8 : vector<16x256xf32>
    %c32_i32 = arith.constant 32 : i32
    %10 = tpu.dynamic_rotate %1 by %c32_i32 dim 1 : vector<16x256xf32>, i32 -> vector<16x256xf32>
    %11 = vector.extract_strided_slice %2 {offsets = [1, 0], sizes = [1, 256], strides = [1, 1]} : vector<9x256xf32> to vector<1x256xf32>
    %12 = vector.broadcast %11 : vector<1x256xf32> to vector<16x256xf32>
    %13 = arith.mulf %10, %12 : vector<16x256xf32>
    %c30_i32 = arith.constant 30 : i32
    %14 = tpu.dynamic_rotate %1 by %c30_i32 dim 1 : vector<16x256xf32>, i32 -> vector<16x256xf32>
    %15 = vector.extract_strided_slice %2 {offsets = [2, 0], sizes = [1, 256], strides = [1, 1]} : vector<9x256xf32> to vector<1x256xf32>
    %16 = vector.broadcast %15 : vector<1x256xf32> to vector<16x256xf32>
    %17 = arith.mulf %14, %16 : vector<16x256xf32>
    %c2_i32 = arith.constant 2 : i32
    %18 = tpu.dynamic_rotate %1 by %c2_i32 dim 1 : vector<16x256xf32>, i32 -> vector<16x256xf32>
    %19 = vector.extract_strided_slice %2 {offsets = [3, 0], sizes = [1, 256], strides = [1, 1]} : vector<9x256xf32> to vector<1x256xf32>
    %20 = vector.broadcast %19 : vector<1x256xf32> to vector<16x256xf32>
    %21 = arith.mulf %18, %20 : vector<16x256xf32>
    %c254_i32 = arith.constant 254 : i32
    %22 = tpu.dynamic_rotate %1 by %c254_i32 dim 1 : vector<16x256xf32>, i32 -> vector<16x256xf32>
    %23 = vector.extract_strided_slice %2 {offsets = [5, 0], sizes = [1, 256], strides = [1, 1]} : vector<9x256xf32> to vector<1x256xf32>
    %24 = vector.broadcast %23 : vector<1x256xf32> to vector<16x256xf32>
    %25 = arith.mulf %22, %24 : vector<16x256xf32>
    %c226_i32 = arith.constant 226 : i32
    %26 = tpu.dynamic_rotate %1 by %c226_i32 dim 1 : vector<16x256xf32>, i32 -> vector<16x256xf32>
    %27 = vector.extract_strided_slice %2 {offsets = [6, 0], sizes = [1, 256], strides = [1, 1]} : vector<9x256xf32> to vector<1x256xf32>
    %28 = vector.broadcast %27 : vector<1x256xf32> to vector<16x256xf32>
    %29 = arith.mulf %26, %28 : vector<16x256xf32>
    %c224_i32 = arith.constant 224 : i32
    %30 = tpu.dynamic_rotate %1 by %c224_i32 dim 1 : vector<16x256xf32>, i32 -> vector<16x256xf32>
    %31 = vector.extract_strided_slice %2 {offsets = [7, 0], sizes = [1, 256], strides = [1, 1]} : vector<9x256xf32> to vector<1x256xf32>
    %32 = vector.broadcast %31 : vector<1x256xf32> to vector<16x256xf32>
    %33 = arith.mulf %30, %32 : vector<16x256xf32>
    %c222_i32 = arith.constant 222 : i32
    %34 = tpu.dynamic_rotate %1 by %c222_i32 dim 1 : vector<16x256xf32>, i32 -> vector<16x256xf32>
    %35 = vector.extract_strided_slice %2 {offsets = [8, 0], sizes = [1, 256], strides = [1, 1]} : vector<9x256xf32> to vector<1x256xf32>
    %36 = vector.broadcast %35 : vector<1x256xf32> to vector<16x256xf32>
    %37 = arith.mulf %34, %36 : vector<16x256xf32>
    %38 = tpu.concatenate %9, %13, %17, %21, %1, %25, %29, %33, %37 in 0 : vector<16x256xf32>, vector<16x256xf32>, vector<16x256xf32>, vector<16x256xf32>, vector<16x256xf32>, vector<16x256xf32>, vector<16x256xf32>, vector<16x256xf32>, vector<16x256xf32> -> vector<144x256xf32>
    %cst = arith.constant dense<0.000000e+00> : vector<8x256xf32>
    %39 = tpu.matmul %4, %38, %cst {dimension_numbers = #tpu.dot_dimension_numbers<[1], [0], [0], [1], [0, 0, 1, 1], [], []>} : vector<8x144xf32>, vector<144x256xf32>, vector<8x256xf32> -> vector<8x256xf32>
    %40 = vector.broadcast %5 : vector<8x1xf32> to vector<8x256xf32>
    %41 = arith.addf %39, %40 : vector<8x256xf32>
    %cst_10 = arith.constant 0.000000e+00 : f32
    %42 = vector.broadcast %cst_10 : f32 to vector<8x256xf32>
    %43 = arith.maximumf %41, %42 : vector<8x256xf32>
    %c0_11 = arith.constant 0 : index
    %c0_12 = arith.constant 0 : index
    %44 = vector.load %arg9[%c0_11, %c0_12] : memref<8x72xf32, #tpu.memory_space<vmem>>, vector<8x72xf32>
    %c0_13 = arith.constant 0 : index
    %c0_14 = arith.constant 0 : index
    %45 = vector.load %arg10[%c0_13, %c0_14] : memref<8x1xf32, #tpu.memory_space<vmem>>, vector<8x1xf32>
    %c34_i32_15 = arith.constant 34 : i32
    %46 = tpu.dynamic_rotate %43 by %c34_i32_15 dim 1 : vector<8x256xf32>, i32 -> vector<8x256xf32>
    %47 = vector.extract_strided_slice %2 {offsets = [0, 0], sizes = [1, 256], strides = [1, 1]} : vector<9x256xf32> to vector<1x256xf32>
    %48 = vector.broadcast %47 : vector<1x256xf32> to vector<8x256xf32>
    %49 = arith.mulf %46, %48 : vector<8x256xf32>
    %c32_i32_16 = arith.constant 32 : i32
    %50 = tpu.dynamic_rotate %43 by %c32_i32_16 dim 1 : vector<8x256xf32>, i32 -> vector<8x256xf32>
    %51 = vector.extract_strided_slice %2 {offsets = [1, 0], sizes = [1, 256], strides = [1, 1]} : vector<9x256xf32> to vector<1x256xf32>
    %52 = vector.broadcast %51 : vector<1x256xf32> to vector<8x256xf32>
    %53 = arith.mulf %50, %52 : vector<8x256xf32>
    %c30_i32_17 = arith.constant 30 : i32
    %54 = tpu.dynamic_rotate %43 by %c30_i32_17 dim 1 : vector<8x256xf32>, i32 -> vector<8x256xf32>
    %55 = vector.extract_strided_slice %2 {offsets = [2, 0], sizes = [1, 256], strides = [1, 1]} : vector<9x256xf32> to vector<1x256xf32>
    %56 = vector.broadcast %55 : vector<1x256xf32> to vector<8x256xf32>
    %57 = arith.mulf %54, %56 : vector<8x256xf32>
    %c2_i32_18 = arith.constant 2 : i32
    %58 = tpu.dynamic_rotate %43 by %c2_i32_18 dim 1 : vector<8x256xf32>, i32 -> vector<8x256xf32>
    %59 = vector.extract_strided_slice %2 {offsets = [3, 0], sizes = [1, 256], strides = [1, 1]} : vector<9x256xf32> to vector<1x256xf32>
    %60 = vector.broadcast %59 : vector<1x256xf32> to vector<8x256xf32>
    %61 = arith.mulf %58, %60 : vector<8x256xf32>
    %c254_i32_19 = arith.constant 254 : i32
    %62 = tpu.dynamic_rotate %43 by %c254_i32_19 dim 1 : vector<8x256xf32>, i32 -> vector<8x256xf32>
    %63 = vector.extract_strided_slice %2 {offsets = [5, 0], sizes = [1, 256], strides = [1, 1]} : vector<9x256xf32> to vector<1x256xf32>
    %64 = vector.broadcast %63 : vector<1x256xf32> to vector<8x256xf32>
    %65 = arith.mulf %62, %64 : vector<8x256xf32>
    %c226_i32_20 = arith.constant 226 : i32
    %66 = tpu.dynamic_rotate %43 by %c226_i32_20 dim 1 : vector<8x256xf32>, i32 -> vector<8x256xf32>
    %67 = vector.extract_strided_slice %2 {offsets = [6, 0], sizes = [1, 256], strides = [1, 1]} : vector<9x256xf32> to vector<1x256xf32>
    %68 = vector.broadcast %67 : vector<1x256xf32> to vector<8x256xf32>
    %69 = arith.mulf %66, %68 : vector<8x256xf32>
    %c224_i32_21 = arith.constant 224 : i32
    %70 = tpu.dynamic_rotate %43 by %c224_i32_21 dim 1 : vector<8x256xf32>, i32 -> vector<8x256xf32>
    %71 = vector.extract_strided_slice %2 {offsets = [7, 0], sizes = [1, 256], strides = [1, 1]} : vector<9x256xf32> to vector<1x256xf32>
    %72 = vector.broadcast %71 : vector<1x256xf32> to vector<8x256xf32>
    %73 = arith.mulf %70, %72 : vector<8x256xf32>
    %c222_i32_22 = arith.constant 222 : i32
    %74 = tpu.dynamic_rotate %43 by %c222_i32_22 dim 1 : vector<8x256xf32>, i32 -> vector<8x256xf32>
    %75 = vector.extract_strided_slice %2 {offsets = [8, 0], sizes = [1, 256], strides = [1, 1]} : vector<9x256xf32> to vector<1x256xf32>
    %76 = vector.broadcast %75 : vector<1x256xf32> to vector<8x256xf32>
    %77 = arith.mulf %74, %76 : vector<8x256xf32>
    %78 = tpu.concatenate %49, %53, %57, %61, %43, %65, %69, %73, %77 in 0 : vector<8x256xf32>, vector<8x256xf32>, vector<8x256xf32>, vector<8x256xf32>, vector<8x256xf32>, vector<8x256xf32>, vector<8x256xf32>, vector<8x256xf32>, vector<8x256xf32> -> vector<72x256xf32>
    %cst_23 = arith.constant dense<0.000000e+00> : vector<8x256xf32>
    %79 = tpu.matmul %44, %78, %cst_23 {dimension_numbers = #tpu.dot_dimension_numbers<[1], [0], [0], [1], [0, 0, 1, 1], [], []>} : vector<8x72xf32>, vector<72x256xf32>, vector<8x256xf32> -> vector<8x256xf32>
    %80 = vector.broadcast %45 : vector<8x1xf32> to vector<8x256xf32>
    %81 = arith.addf %79, %80 : vector<8x256xf32>
    %cst_24 = arith.constant 0.000000e+00 : f32
    %82 = vector.broadcast %cst_24 : f32 to vector<8x256xf32>
    %83 = arith.maximumf %81, %82 : vector<8x256xf32>
    %c0_25 = arith.constant 0 : index
    %c0_26 = arith.constant 0 : index
    %84 = vector.load %arg11[%c0_25, %c0_26] : memref<8x72xf32, #tpu.memory_space<vmem>>, vector<8x72xf32>
    %c0_27 = arith.constant 0 : index
    %c0_28 = arith.constant 0 : index
    %85 = vector.load %arg12[%c0_27, %c0_28] : memref<8x1xf32, #tpu.memory_space<vmem>>, vector<8x1xf32>
    %c17_i32 = arith.constant 17 : i32
    %86 = tpu.dynamic_rotate %83 by %c17_i32 dim 1 : vector<8x256xf32>, i32 -> vector<8x256xf32>
    %87 = vector.extract_strided_slice %3 {offsets = [0, 0], sizes = [1, 256], strides = [1, 1]} : vector<9x256xf32> to vector<1x256xf32>
    %88 = vector.broadcast %87 : vector<1x256xf32> to vector<8x256xf32>
    %89 = arith.mulf %86, %88 : vector<8x256xf32>
    %c16_i32 = arith.constant 16 : i32
    %90 = tpu.dynamic_rotate %83 by %c16_i32 dim 1 : vector<8x256xf32>, i32 -> vector<8x256xf32>
    %91 = vector.extract_strided_slice %3 {offsets = [1, 0], sizes = [1, 256], strides = [1, 1]} : vector<9x256xf32> to vector<1x256xf32>
    %92 = vector.broadcast %91 : vector<1x256xf32> to vector<8x256xf32>
    %93 = arith.mulf %90, %92 : vector<8x256xf32>
    %c15_i32 = arith.constant 15 : i32
    %94 = tpu.dynamic_rotate %83 by %c15_i32 dim 1 : vector<8x256xf32>, i32 -> vector<8x256xf32>
    %95 = vector.extract_strided_slice %3 {offsets = [2, 0], sizes = [1, 256], strides = [1, 1]} : vector<9x256xf32> to vector<1x256xf32>
    %96 = vector.broadcast %95 : vector<1x256xf32> to vector<8x256xf32>
    %97 = arith.mulf %94, %96 : vector<8x256xf32>
    %c1_i32 = arith.constant 1 : i32
    %98 = tpu.dynamic_rotate %83 by %c1_i32 dim 1 : vector<8x256xf32>, i32 -> vector<8x256xf32>
    %99 = vector.extract_strided_slice %3 {offsets = [3, 0], sizes = [1, 256], strides = [1, 1]} : vector<9x256xf32> to vector<1x256xf32>
    %100 = vector.broadcast %99 : vector<1x256xf32> to vector<8x256xf32>
    %101 = arith.mulf %98, %100 : vector<8x256xf32>
    %c255_i32 = arith.constant 255 : i32
    %102 = tpu.dynamic_rotate %83 by %c255_i32 dim 1 : vector<8x256xf32>, i32 -> vector<8x256xf32>
    %103 = vector.extract_strided_slice %3 {offsets = [5, 0], sizes = [1, 256], strides = [1, 1]} : vector<9x256xf32> to vector<1x256xf32>
    %104 = vector.broadcast %103 : vector<1x256xf32> to vector<8x256xf32>
    %105 = arith.mulf %102, %104 : vector<8x256xf32>
    %c241_i32 = arith.constant 241 : i32
    %106 = tpu.dynamic_rotate %83 by %c241_i32 dim 1 : vector<8x256xf32>, i32 -> vector<8x256xf32>
    %107 = vector.extract_strided_slice %3 {offsets = [6, 0], sizes = [1, 256], strides = [1, 1]} : vector<9x256xf32> to vector<1x256xf32>
    %108 = vector.broadcast %107 : vector<1x256xf32> to vector<8x256xf32>
    %109 = arith.mulf %106, %108 : vector<8x256xf32>
    %c240_i32 = arith.constant 240 : i32
    %110 = tpu.dynamic_rotate %83 by %c240_i32 dim 1 : vector<8x256xf32>, i32 -> vector<8x256xf32>
    %111 = vector.extract_strided_slice %3 {offsets = [7, 0], sizes = [1, 256], strides = [1, 1]} : vector<9x256xf32> to vector<1x256xf32>
    %112 = vector.broadcast %111 : vector<1x256xf32> to vector<8x256xf32>
    %113 = arith.mulf %110, %112 : vector<8x256xf32>
    %c239_i32 = arith.constant 239 : i32
    %114 = tpu.dynamic_rotate %83 by %c239_i32 dim 1 : vector<8x256xf32>, i32 -> vector<8x256xf32>
    %115 = vector.extract_strided_slice %3 {offsets = [8, 0], sizes = [1, 256], strides = [1, 1]} : vector<9x256xf32> to vector<1x256xf32>
    %116 = vector.broadcast %115 : vector<1x256xf32> to vector<8x256xf32>
    %117 = arith.mulf %114, %116 : vector<8x256xf32>
    %118 = tpu.concatenate %89, %93, %97, %101, %83, %105, %109, %113, %117 in 0 : vector<8x256xf32>, vector<8x256xf32>, vector<8x256xf32>, vector<8x256xf32>, vector<8x256xf32>, vector<8x256xf32>, vector<8x256xf32>, vector<8x256xf32>, vector<8x256xf32> -> vector<72x256xf32>
    %cst_29 = arith.constant dense<0.000000e+00> : vector<8x256xf32>
    %119 = tpu.matmul %84, %118, %cst_29 {dimension_numbers = #tpu.dot_dimension_numbers<[1], [0], [0], [1], [0, 0, 1, 1], [], []>} : vector<8x72xf32>, vector<72x256xf32>, vector<8x256xf32> -> vector<8x256xf32>
    %120 = vector.broadcast %85 : vector<8x1xf32> to vector<8x256xf32>
    %121 = arith.addf %119, %120 : vector<8x256xf32>
    %cst_30 = arith.constant 0.000000e+00 : f32
    %122 = vector.broadcast %cst_30 : f32 to vector<8x256xf32>
    %123 = arith.maximumf %121, %122 : vector<8x256xf32>
    %c0_31 = arith.constant 0 : index
    %c0_32 = arith.constant 0 : index
    %124 = vector.load %arg13[%c0_31, %c0_32] : memref<16x8xf32, #tpu.memory_space<vmem>>, vector<16x8xf32>
    %cst_33 = arith.constant dense<0.000000e+00> : vector<16x256xf32>
    %125 = tpu.matmul %124, %123, %cst_33 {dimension_numbers = #tpu.dot_dimension_numbers<[1], [0], [0], [1], [0, 0, 1, 1], [], []>} : vector<16x8xf32>, vector<8x256xf32>, vector<16x256xf32> -> vector<16x256xf32>
    %c0_34 = arith.constant 0 : index
    %c0_35 = arith.constant 0 : index
    %126 = vector.load %arg14[%c0_34, %c0_35] : memref<16x1xf32, #tpu.memory_space<vmem>>, vector<16x1xf32>
    %127 = vector.broadcast %126 : vector<16x1xf32> to vector<16x256xf32>
    %128 = arith.addf %125, %127 : vector<16x256xf32>
    %c0_36 = arith.constant 0 : index
    %c0_37 = arith.constant 0 : index
    %129 = vector.load %arg4[%c0_36, %c0_37] : memref<256x32xf32, #tpu.memory_space<vmem>>, vector<256x32xf32>
    %cst_38 = arith.constant dense<0.000000e+00> : vector<16x32xf32>
    %130 = tpu.matmul %128, %129, %cst_38 {dimension_numbers = #tpu.dot_dimension_numbers<[1], [0], [0], [1], [0, 0, 1, 1], [], []>} : vector<16x256xf32>, vector<256x32xf32>, vector<16x32xf32> -> vector<16x32xf32>
    %c0_39 = arith.constant 0 : index
    %c0_40 = arith.constant 0 : index
    %131 = vector.load %arg15[%c0_39, %c0_40] : memref<8x16xf32, #tpu.memory_space<vmem>>, vector<8x16xf32>
    %cst_41 = arith.constant dense<0.000000e+00> : vector<8x32xf32>
    %132 = tpu.matmul %131, %130, %cst_41 {dimension_numbers = #tpu.dot_dimension_numbers<[1], [0], [0], [1], [0, 0, 1, 1], [], []>} : vector<8x16xf32>, vector<16x32xf32>, vector<8x32xf32> -> vector<8x32xf32>
    %c0_42 = arith.constant 0 : index
    %c0_43 = arith.constant 0 : index
    %133 = vector.load %arg16[%c0_42, %c0_43] : memref<8x1xf32, #tpu.memory_space<vmem>>, vector<8x1xf32>
    %134 = vector.broadcast %133 : vector<8x1xf32> to vector<8x32xf32>
    %135 = arith.addf %132, %134 : vector<8x32xf32>
    %cst_44 = arith.constant 3.000000e+00 : f32
    %136 = vector.broadcast %cst_44 : f32 to vector<8x32xf32>
    %137 = arith.addf %135, %136 : vector<8x32xf32>
    %cst_45 = arith.constant 0.000000e+00 : f32
    %cst_46 = arith.constant 6.000000e+00 : f32
    %138 = vector.broadcast %cst_45 : f32 to vector<8x32xf32>
    %139 = arith.maximumf %138, %137 : vector<8x32xf32>
    %140 = vector.broadcast %cst_46 : f32 to vector<8x32xf32>
    %141 = arith.minimumf %140, %139 : vector<8x32xf32>
    %142 = arith.mulf %135, %141 : vector<8x32xf32>
    %cst_47 = arith.constant 0.166666672 : f32
    %143 = vector.broadcast %cst_47 : f32 to vector<8x32xf32>
    %144 = arith.mulf %142, %143 : vector<8x32xf32>
    %c0_48 = arith.constant 0 : index
    %c0_49 = arith.constant 0 : index
    %145 = vector.load %arg17[%c0_48, %c0_49] : memref<16x8xf32, #tpu.memory_space<vmem>>, vector<16x8xf32>
    %146 = vector.extract_strided_slice %144 {offsets = [0, 0], sizes = [8, 16], strides = [1, 1]} : vector<8x32xf32> to vector<8x16xf32>
    %cst_50 = arith.constant dense<0.000000e+00> : vector<16x16xf32>
    %147 = tpu.matmul %145, %146, %cst_50 {dimension_numbers = #tpu.dot_dimension_numbers<[1], [0], [0], [1], [0, 0, 1, 1], [], []>} : vector<16x8xf32>, vector<8x16xf32>, vector<16x16xf32> -> vector<16x16xf32>
    %c0_51 = arith.constant 0 : index
    %c0_52 = arith.constant 0 : index
    %148 = vector.load %arg18[%c0_51, %c0_52] : memref<16x1xf32, #tpu.memory_space<vmem>>, vector<16x1xf32>
    %149 = vector.broadcast %148 : vector<16x1xf32> to vector<16x16xf32>
    %150 = arith.addf %147, %149 : vector<16x16xf32>
    %151 = arith.negf %150 : vector<16x16xf32>
    %152 = math.exp %151 : vector<16x16xf32>
    %cst_53 = arith.constant 1.000000e+00 : f32
    %153 = vector.broadcast %cst_53 : f32 to vector<16x16xf32>
    %154 = arith.addf %153, %152 : vector<16x16xf32>
    %155 = arith.divf %153, %154 : vector<16x16xf32>
    %c0_54 = arith.constant 0 : index
    %c0_55 = arith.constant 0 : index
    %156 = vector.load %arg19[%c0_54, %c0_55] : memref<16x8xf32, #tpu.memory_space<vmem>>, vector<16x8xf32>
    %157 = vector.extract_strided_slice %144 {offsets = [0, 16], sizes = [8, 16], strides = [1, 1]} : vector<8x32xf32> to vector<8x16xf32>
    %cst_56 = arith.constant dense<0.000000e+00> : vector<16x16xf32>
    %158 = tpu.matmul %156, %157, %cst_56 {dimension_numbers = #tpu.dot_dimension_numbers<[1], [0], [0], [1], [0, 0, 1, 1], [], []>} : vector<16x8xf32>, vector<8x16xf32>, vector<16x16xf32> -> vector<16x16xf32>
    %c0_57 = arith.constant 0 : index
    %c0_58 = arith.constant 0 : index
    %159 = vector.load %arg20[%c0_57, %c0_58] : memref<16x1xf32, #tpu.memory_space<vmem>>, vector<16x1xf32>
    %160 = vector.broadcast %159 : vector<16x1xf32> to vector<16x16xf32>
    %161 = arith.addf %158, %160 : vector<16x16xf32>
    %162 = arith.negf %161 : vector<16x16xf32>
    %163 = math.exp %162 : vector<16x16xf32>
    %cst_59 = arith.constant 1.000000e+00 : f32
    %164 = vector.broadcast %cst_59 : f32 to vector<16x16xf32>
    %165 = arith.addf %164, %163 : vector<16x16xf32>
    %166 = arith.divf %164, %165 : vector<16x16xf32>
    %c0_60 = arith.constant 0 : index
    %c0_61 = arith.constant 0 : index
    %167 = vector.load %arg5[%c0_60, %c0_61] : memref<16x256xf32, #tpu.memory_space<vmem>>, vector<16x256xf32>
    %cst_62 = arith.constant dense<0.000000e+00> : vector<16x256xf32>
    %168 = tpu.matmul %155, %167, %cst_62 {dimension_numbers = #tpu.dot_dimension_numbers<[1], [0], [0], [1], [0, 0, 1, 1], [], []>} : vector<16x16xf32>, vector<16x256xf32>, vector<16x256xf32> -> vector<16x256xf32>
    %c0_63 = arith.constant 0 : index
    %c0_64 = arith.constant 0 : index
    %169 = vector.load %arg6[%c0_63, %c0_64] : memref<16x256xf32, #tpu.memory_space<vmem>>, vector<16x256xf32>
    %cst_65 = arith.constant dense<0.000000e+00> : vector<16x256xf32>
    %170 = tpu.matmul %166, %169, %cst_65 {dimension_numbers = #tpu.dot_dimension_numbers<[1], [0], [0], [1], [0, 0, 1, 1], [], []>} : vector<16x16xf32>, vector<16x256xf32>, vector<16x256xf32> -> vector<16x256xf32>
    %171 = arith.mulf %168, %170 : vector<16x256xf32>
    %172 = arith.mulf %128, %171 : vector<16x256xf32>
    %173 = arith.addf %172, %1 : vector<16x256xf32>
    %cst_66 = arith.constant 0.000000e+00 : f32
    %174 = vector.broadcast %cst_66 : f32 to vector<16x256xf32>
    %175 = arith.maximumf %173, %174 : vector<16x256xf32>
    %c0_67 = arith.constant 0 : index
    %c0_68 = arith.constant 0 : index
    %c0_69 = arith.constant 0 : index
    %176 = vector.load %arg21[%c0_67, %c0_68, %c0_69] : memref<1x16x256xf32, #tpu.memory_space<vmem>>, vector<1x16x256xf32>
    %177 = vector.shape_cast %176 : vector<1x16x256xf32> to vector<16x256xf32>
    %178 = vector.shape_cast %175 : vector<16x256xf32> to vector<1x16x256xf32>
    tpu.vector_store %arg21[%c0_67, %c0_68, %c0_69], %178 {strides = array<i32>} : memref<1x16x256xf32, #tpu.memory_space<vmem>>, vector<1x16x256xf32>,
    return
  }
  func.func @transform_0(%arg0: i32) -> (i32, i32, i32) {
    %c0_i32 = arith.constant 0 : i32
    %c0_i32_0 = arith.constant 0 : i32
    %c0_i32_1 = arith.constant 0 : i32
    return %arg0, %c0_i32, %c0_i32_0 : i32, i32, i32
  }
  func.func @transform_1(%arg0: i32) -> (i32, i32) {
    %c0_i32 = arith.constant 0 : i32
    %c0_i32_0 = arith.constant 0 : i32
    %c0_i32_1 = arith.constant 0 : i32
    return %c0_i32, %c0_i32_0 : i32, i32
  }
  func.func @transform_2(%arg0: i32) -> (i32, i32) {
    %c0_i32 = arith.constant 0 : i32
    %c0_i32_0 = arith.constant 0 : i32
    %c0_i32_1 = arith.constant 0 : i32
    return %c0_i32, %c0_i32_0 : i32, i32
  }
  func.func @transform_3(%arg0: i32) -> (i32, i32) {
    %c0_i32 = arith.constant 0 : i32
    %c0_i32_0 = arith.constant 0 : i32
    %c0_i32_1 = arith.constant 0 : i32
    return %c0_i32, %c0_i32_0 : i32, i32
  }
  func.func @transform_4(%arg0: i32) -> (i32, i32) {
    %c0_i32 = arith.constant 0 : i32
    %c0_i32_0 = arith.constant 0 : i32
    %c0_i32_1 = arith.constant 0 : i32
    return %c0_i32, %c0_i32_0 : i32, i32
  }
  func.func @transform_5(%arg0: i32) -> (i32, i32) {
    %c0_i32 = arith.constant 0 : i32
    %c0_i32_0 = arith.constant 0 : i32
    %c0_i32_1 = arith.constant 0 : i32
    return %c0_i32, %c0_i32_0 : i32, i32
  }
  func.func @transform_6(%arg0: i32) -> (i32, i32) {
    %c0_i32 = arith.constant 0 : i32
    %c0_i32_0 = arith.constant 0 : i32
    %c0_i32_1 = arith.constant 0 : i32
    return %c0_i32, %c0_i32_0 : i32, i32
  }
  func.func @transform_7(%arg0: i32) -> (i32, i32) {
    %c0_i32 = arith.constant 0 : i32
    %c0_i32_0 = arith.constant 0 : i32
    %c0_i32_1 = arith.constant 0 : i32
    return %c0_i32, %c0_i32_0 : i32, i32
  }
  func.func @transform_8(%arg0: i32) -> (i32, i32) {
    %c0_i32 = arith.constant 0 : i32
    %c0_i32_0 = arith.constant 0 : i32
    %c0_i32_1 = arith.constant 0 : i32
    return %c0_i32, %c0_i32_0 : i32, i32
  }
  func.func @transform_9(%arg0: i32) -> (i32, i32) {
    %c0_i32 = arith.constant 0 : i32
    %c0_i32_0 = arith.constant 0 : i32
    %c0_i32_1 = arith.constant 0 : i32
    return %c0_i32, %c0_i32_0 : i32, i32
  }
  func.func @transform_10(%arg0: i32) -> (i32, i32) {
    %c0_i32 = arith.constant 0 : i32
    %c0_i32_0 = arith.constant 0 : i32
    %c0_i32_1 = arith.constant 0 : i32
    return %c0_i32, %c0_i32_0 : i32, i32
  }
  func.func @transform_11(%arg0: i32) -> (i32, i32) {
    %c0_i32 = arith.constant 0 : i32
    %c0_i32_0 = arith.constant 0 : i32
    %c0_i32_1 = arith.constant 0 : i32
    return %c0_i32, %c0_i32_0 : i32, i32
  }
  func.func @transform_12(%arg0: i32) -> (i32, i32) {
    %c0_i32 = arith.constant 0 : i32
    %c0_i32_0 = arith.constant 0 : i32
    %c0_i32_1 = arith.constant 0 : i32
    return %c0_i32, %c0_i32_0 : i32, i32
  }
  func.func @transform_13(%arg0: i32) -> (i32, i32) {
    %c0_i32 = arith.constant 0 : i32
    %c0_i32_0 = arith.constant 0 : i32
    %c0_i32_1 = arith.constant 0 : i32
    return %c0_i32, %c0_i32_0 : i32, i32
  }
  func.func @transform_14(%arg0: i32) -> (i32, i32) {
    %c0_i32 = arith.constant 0 : i32
    %c0_i32_0 = arith.constant 0 : i32
    %c0_i32_1 = arith.constant 0 : i32
    return %c0_i32, %c0_i32_0 : i32, i32
  }
  func.func @transform_15(%arg0: i32) -> (i32, i32) {
    %c0_i32 = arith.constant 0 : i32
    %c0_i32_0 = arith.constant 0 : i32
    %c0_i32_1 = arith.constant 0 : i32
    return %c0_i32, %c0_i32_0 : i32, i32
  }
  func.func @transform_16(%arg0: i32) -> (i32, i32) {
    %c0_i32 = arith.constant 0 : i32
    %c0_i32_0 = arith.constant 0 : i32
    %c0_i32_1 = arith.constant 0 : i32
    return %c0_i32, %c0_i32_0 : i32, i32
  }
  func.func @transform_17(%arg0: i32) -> (i32, i32) {
    %c0_i32 = arith.constant 0 : i32
    %c0_i32_0 = arith.constant 0 : i32
    %c0_i32_1 = arith.constant 0 : i32
    return %c0_i32, %c0_i32_0 : i32, i32
  }
  func.func @transform_18(%arg0: i32) -> (i32, i32) {
    %c0_i32 = arith.constant 0 : i32
    %c0_i32_0 = arith.constant 0 : i32
    %c0_i32_1 = arith.constant 0 : i32
    return %c0_i32, %c0_i32_0 : i32, i32
  }
  func.func @transform_19(%arg0: i32) -> (i32, i32) {
    %c0_i32 = arith.constant 0 : i32
    %c0_i32_0 = arith.constant 0 : i32
    %c0_i32_1 = arith.constant 0 : i32
    return %c0_i32, %c0_i32_0 : i32, i32
  }
  func.func @transform_20(%arg0: i32) -> (i32, i32, i32) {
    %c0_i32 = arith.constant 0 : i32
    %c0_i32_0 = arith.constant 0 : i32
    %c0_i32_1 = arith.constant 0 : i32
    return %arg0, %c0_i32, %c0_i32_0 : i32, i32, i32
  }
}

</mosaic_0001>

<bundles_post_ra>
// kernel: tpu_custom_call.1
= control target key start
LH: loop header
LB: loop body
LE: loop exit
PB: predicated region body
PF: predicated region fallthrough
CT: control target
= control target key end

     0   :  { %s3342_s0 = inlined_call_operand.vmem [shape: f32[2,16,256], index: 0, kind: input, shape index: {}]   ;;  %s3343_s1 = inlined_call_operand.vmem [shape: f32[9,256], index: 1, kind: input, shape index: {}]   ;;  %s3344_s2 = inlined_call_operand.vmem [shape: f32[9,256], index: 2, kind: input, shape index: {}]   ;;  %s3345_s3 = inlined_call_operand.vmem [shape: f32[256,32], index: 3, kind: input, shape index: {}]   ;;  %s3346_s4 = inlined_call_operand.vmem [shape: f32[16,256], index: 4, kind: input, shape index: {}]   ;;  %s3347_s5 = inlined_call_operand.vmem [shape: f32[16,256], index: 5, kind: input, shape index: {}]   ;;  %s3348_s6 = inlined_call_operand.vmem [shape: f32[8,144], index: 6, kind: input, shape index: {}]   ;;  %s3349_s7 = inlined_call_operand.vmem [shape: f32[8,1], index: 7, kind: input, shape index: {}]   ;;  %s3350_s8 = inlined_call_operand.vmem [shape: f32[8,72], index: 8, kind: input, shape index: {}]   ;;  %s3351_s9 = inlined_call_operand.vmem [shape: f32[8,1], index: 9, kind: input, shape index: {}]   ;;  %s3352_s10 = inlined_call_operand.vmem [shape: f32[8,72], index: 10, kind: input, shape index: {}]   ;;  %s3353_s11 = inlined_call_operand.vmem [shape: f32[8,1], index: 11, kind: input, shape index: {}]   ;;  %s3354_s12 = inlined_call_operand.vmem [shape: f32[16,8], index: 12, kind: input, shape index: {}]   ;;  %s3355_s13 = inlined_call_operand.vmem [shape: f32[16,1], index: 13, kind: input, shape index: {}]   ;;  %s3356_s14 = inlined_call_operand.vmem [shape: f32[8,16], index: 14, kind: input, shape index: {}]   ;;  %s3357_s15 = inlined_call_operand.vmem [shape: f32[8,1], index: 15, kind: input, shape index: {}]   ;;  %s3358_s16 = inlined_call_operand.vmem [shape: f32[16,8], index: 16, kind: input, shape index: {}]   ;;  %s3359_s17 = inlined_call_operand.vmem [shape: f32[16,1], index: 17, kind: input, shape index: {}]   ;;  %s3360_s18 = inlined_call_operand.vmem [shape: f32[16,8], index: 18, kind: input, shape index: {}]   ;;  %s3361_s19 = inlined_call_operand.vmem [shape: f32[16,1], index: 19, kind: input, shape index: {}]   ;;  %s3362_s20 = inlined_call_operand.hbm [shape: f32[2,16,256], index: 20, kind: output, shape index: {}]  }
   0x1   :  { %3387 = sst [smem:[#allocation7_spill]] %s3342_s0 }
   0x2   :  { %3388 = sst [smem:[#allocation8_spill]] %s3343_s1 }
   0x3   :  { %3389 = sst [smem:[#allocation9_spill]] %s3344_s2 }
   0x4   :  { %3390 = sst [smem:[#allocation10_spill]] %s3345_s3 }
   0x5   :  { %3391 = sst [smem:[#allocation11_spill]] %s3346_s4 }
   0x6   :  { %3392 = sst [smem:[#allocation12_spill]] %s3348_s6 }
   0x7   :  { %3393 = sst [smem:[#allocation13_spill]] %s3349_s7 }
   0x8   :  { %3394 = sst [smem:[#allocation14_spill]] %s3350_s8 }
   0x9   :  { %3395 = sst [smem:[#allocation15_spill]] %s3351_s9 }
   0xa   :  { %3396 = sst [smem:[#allocation16_spill]] %s3352_s10 }
   0xb   :  { %3397 = sst [smem:[#allocation17_spill]] %s3353_s11 }
   0xc   :  { %25 = vsyncpa [#allocation3], 0 }
   0xd   :  { %27 = vsyncpa [#allocation3 + $0x1], 0  ;;  %s2556_s1 = smov 0   ;;  %s2558_s22 = smov 0  }
   0xe   :  { %s2560_s23 = smov 0   ;;  %s2562_s24 = smov 0  }
   0xf LB: > { %3398 = sst [smem:[#allocation5_spill]] %s2423_s23  ;;  %s2577_s2 = sadd.s32 4294967295, %s2427_s24   ;;  %s2427_s24 = sphi %s2562_s24, %s3427_s24   ;;  %s2423_s23 = sphi %s2560_s23, %s3424_s23   ;;  %s2419_s22 = sphi %s2558_s22, %s3426_s22   ;;  %s2415_s1 = sphi %s2556_s1, %s3425_s1  }
  0x10   : > { %s2072_s25 = sadd.s32 4294967294, %s2427_s24   ;;  %s2581_s3 = sadd.s32 1, %s2427_s24  }
  0x11   : > { %s465_s26 = sadd.s32 1, %s2423_s23  ;;  %s462_s27 = ssub.s32 %s2427_s24, %s2581_s3 }
  0x12   : > { %p475_p0 = scmp.ne.s32.totalorder %s2423_s23, %s2419_s22  ;;  %p463_p1 = scmp.eq.s32.totalorder %s462_s27, 0 }
  0x13   : > { %p476_p2 = scmp.eq.s32.totalorder %s2577_s2, 1  ;;  %p481_p3 = scmp.ne.s32.totalorder %s2419_s22, %s2415_s1 }
  0x14   : > { %p482_p4 = scmp.eq.s32.totalorder %s2072_s25, 1  ;;  %p2075_p7 = scmp.ge.s32.totalorder %s2427_s24, 1 }
  0x15   : > { %s2592_s28 = scalar_select %p463_p1, %s2423_s23, %s465_s26  }
  0x16   : > { %p2594_p5 = por %p476_p2, %p475_p0  ;;  %p2598_p6 = por %p482_p4, %p481_p3 }
  0x17   : > { %3399 = sst [smem:[#allocation6_spill]] %s2592_s28  ;;  %p565_p8 = scmp.lt.s32.totalorder %s2427_s24, 3 }
  0x19   : > { %p566_p9 = pnand %p2075_p7, %p565_p8 }
  0x1a   : > { %p623_p10 = scmp.lt.s32.totalorder (!%p566_p9), %s2577_s2, 1  ;;  %s3402_s26 = sld [smem:[#allocation7_spill]] (!%p566_p9)  ;;  %vm850_vm0 = vcmask (!%p566_p9), 130048   ;;  %v2437_v5 = vmov (!%p566_p9), 0   ;;  %v651_v7 = vlaneseq (!%p566_p9)  ;;  %vm998_vm9 = vcmask (!%p566_p9), 588800  }
  0x1b   : > { %569 = sbr.rel (%p566_p9) target bundleno = 2441 (0x989), region = 100  ;;  %s3377_s28 = smov (!%p566_p9), 34   ;;  %2343 = vset.pattern.permute.xlu0 (!%p566_p9), %v2437_v5  ;;  %2344 = vset.pattern.permute.xlu1 (!%p566_p9), %v2437_v5 }
  0x1c   : > { %s3367_s21 = smov (!%p566_p9), 2   ;;  %s3369_s25 = smov (!%p566_p9), 126   ;;  %v2694_v8 = vshrl.u32 (!%p566_p9), %v651_v7, 7  ;;  %v2696_v9 = vand.u32 (!%p566_p9), 127, %v651_v7 }
  0x1d   : > { %s3403_s6 = sld [smem:[#allocation12_spill]] (!%p566_p9)  ;;  %s3404_s7 = sld [smem:[#allocation13_spill]] (!%p566_p9) }
  0x1e   : > { %v2699_v10 = vsub.s32 (!%p566_p9), 0, %v2694_v8  ;;  %vm653_vm1 = vcmp.lt.s32.totalorder (!%p566_p9), %v2696_v9, 34  ;;  %v2729_v23 = vsub.s32 (!%p566_p9), 1, %v2694_v8  ;;  %vm678_vm2 = vcmp.lt.s32.totalorder (!%p566_p9), %v2696_v9, 32  ;;  %s3406_s23 = smov (!%p566_p9), 32   ;;  %s3414_s9 = sld [smem:[#allocation15_spill]] (!%p566_p9) }
  0x1f   : > { %v2745_v36 = vsub.s32 (!%p566_p9), 2, %v2694_v8  ;;  %vm703_vm3 = vcmp.lt.s32.totalorder (!%p566_p9), %v2696_v9, 30  ;;  %v2769_v53 = vsub.s32 (!%p566_p9), 3, %v2694_v8  ;;  %vm728_vm4 = vcmp.lt.s32.totalorder (!%p566_p9), %v2696_v9, 2  ;;  %s3415_s8 = sld [smem:[#allocation14_spill]] (!%p566_p9)  ;;  %s3416_s11 = sld [smem:[#allocation17_spill]] (!%p566_p9) }
  0x20   : > { %vm753_vm5 = vcmp.lt.s32.totalorder (!%p566_p9), %v2696_v9, 126  ;;  %vm778_vm6 = vcmp.lt.s32.totalorder (!%p566_p9), %v2696_v9, 98  ;;  %vm803_vm7 = vcmp.lt.s32.totalorder (!%p566_p9), %v2696_v9, 96  ;;  %vm828_vm8 = vcmp.lt.s32.totalorder (!%p566_p9), %v2696_v9, 94  ;;  %s3418_s10 = sld [smem:[#allocation16_spill]] (!%p566_p9) }
  0x21   : > { %vm1081_vm10 = vcmp.lt.s32.totalorder (!%p566_p9), %v2696_v9, 17  ;;  %vm1098_vm11 = vcmp.lt.s32.totalorder (!%p566_p9), %v2696_v9, 16  ;;  %vm1115_vm12 = vcmp.lt.s32.totalorder (!%p566_p9), %v2696_v9, 15  ;;  %vm1132_vm13 = vcmp.lt.s32.totalorder (!%p566_p9), %v2696_v9, 1 }
  0x22   : > { %s624_s30 = scalar_select %p623_p10, %s2577_s2, 1  ;;  %vm1149_vm14 = vcmp.lt.s32.totalorder %v2696_v9, 127  ;;  %vm1166_vm15 = vcmp.lt.s32.totalorder %v2696_v9, 113 }
  0x23   : > { %v641_v4 = vld [vmem:[%s3403_s6 + $0x8] sm:$0xff]  ;;  %v642_v6 = vld [vmem:[%s3404_s7] sm:$0xff]  ;;  %s3417_s7 = sld [smem:[#allocation9_spill]] }
  0x24   : > { %s2106_s0 = sshll.u32 %s624_s30, 5  ;;  %s3379_s30 = smov 32   ;;  %2081 = vmatprep.mubr.msk.f32.mxu0 %vm850_vm0, %v641_v4 }
  0x25   : > { %s2609_s27 = scalar_lea.vmem %s3402_s26, %s2106_s0  ;;  %s3371_s0 = smov 30  }
  0x26   : > { %v2612_v0 = vld [vmem:[%s2609_s27 + $0x8] sm:$0xff]  ;;  %v2615_v1 = vld [vmem:[%s2609_s27] sm:$0xff]  ;;  %v2622_v2 = vld [vmem:[%s2609_s27 + $0x18] sm:$0xff]  ;;  %s3373_s26 = smov 98  }
  0x27   : > { %647 = vrot.lane.b32.xlu1 %v2612_v0, %s3377_s28  ;;  %643 = vrot.lane.b32.xlu0 %v2615_v1, %s3377_s28  ;;  %v2625_v3 = vld [vmem:[%s2609_s27 + $0x10] sm:$0xff] }
  0x2b   : > { %649 = vrot.lane.b32.xlu1 %v2622_v2, %s3377_s28  ;;  %645 = vrot.lane.b32.xlu0 %v2625_v3, %s3377_s28  ;;  %s3407_s28 = smov 34  }
  0x2f   : > { %672 = vrot.lane.b32.xlu1 %v2625_v3, %s3379_s30  ;;  %670 = vrot.lane.b32.xlu0 %v2615_v1, %s3379_s30 }
  0x33   : > { %676 = vrot.lane.b32.xlu1 %v2622_v2, %s3379_s30  ;;  %674 = vrot.lane.b32.xlu0 %v2612_v0, %s3379_s30  ;;  %s3405_s30 = sld [smem:[#allocation8_spill]] }
  0x37   : > { %697 = vrot.lane.b32.xlu1 %v2625_v3, %s3371_s0  ;;  %695 = vrot.lane.b32.xlu0 %v2615_v1, %s3371_s0 }
  0x39   : > { %v2704_v11 = vld [vmem:[%s3405_s30] sm:$0xff]  ;;  %v2709_v12 = vld [vmem:[%s3405_s30 + $0x8] sm:$0xff] }
  0x3a   : > { %v2714_v15 = vrot.slane %v2704_v11, %v2699_v10  ;;  %v2718_v16 = vrot.slane %v2709_v12, %v2699_v10  ;;  %v2738_v32 = vrot.slane %v2704_v11, %v2729_v23  ;;  %v2742_v33 = vrot.slane %v2709_v12, %v2729_v23 }
  0x3b   : > { %701 = vrot.lane.b32.xlu1 %v2622_v2, %s3371_s0  ;;  %699 = vrot.lane.b32.xlu0 %v2612_v0, %s3371_s0  ;;  %v2762_v49 = vrot.slane %v2704_v11, %v2745_v36  ;;  %v2766_v50 = vrot.slane %v2709_v12, %v2745_v36  ;;  %v2790_v7 = vrot.slane %v2709_v12, %v2769_v53  ;;  %s3410_s0 = smov 126  }
  0x3f   : > { %722 = vrot.lane.b32.xlu1 %v2625_v3, %s3367_s21  ;;  %720 = vrot.lane.b32.xlu0 %v2615_v1, %s3367_s21 }
  0x43   : > { %726 = vrot.lane.b32.xlu1 %v2622_v2, %s3367_s21  ;;  %724 = vrot.lane.b32.xlu0 %v2612_v0, %s3367_s21  ;;  %s3375_s21 = smov 96  }
  0x47   : > { %747 = vrot.lane.b32.xlu1 %v2625_v3, %s3369_s25  ;;  %745 = vrot.lane.b32.xlu0 %v2615_v1, %s3369_s25 }
  0x4b   : > { %751 = vrot.lane.b32.xlu1 %v2622_v2, %s3369_s25  ;;  %749 = vrot.lane.b32.xlu0 %v2612_v0, %s3369_s25  ;;  %s3411_s25 = smov 98  }
  0x4f   : > { %772 = vrot.lane.b32.xlu1 %v2625_v3, %s3373_s26  ;;  %770 = vrot.lane.b32.xlu0 %v2615_v1, %s3373_s26 }
  0x53   : > { %776 = vrot.lane.b32.xlu1 %v2622_v2, %s3373_s26  ;;  %774 = vrot.lane.b32.xlu0 %v2612_v0, %s3373_s26  ;;  %s3382_s26 = smov 94  }
  0x57   : > { %797 = vrot.lane.b32.xlu1 %v2625_v3, %s3375_s21  ;;  %795 = vrot.lane.b32.xlu0 %v2615_v1, %s3375_s21 }
  0x5b   : > { %801 = vrot.lane.b32.xlu1 %v2622_v2, %s3375_s21  ;;  %799 = vrot.lane.b32.xlu0 %v2612_v0, %s3375_s21  ;;  %s3408_s21 = smov 30  }
  0x5f   : > { %822 = vrot.lane.b32.xlu1 %v2625_v3, %s3382_s26  ;;  %820 = vrot.lane.b32.xlu0 %v2615_v1, %s3382_s26 }
  0x63   : > { %826 = vrot.lane.b32.xlu1 %v2622_v2, %s3382_s26  ;;  %824 = vrot.lane.b32.xlu0 %v2612_v0, %s3382_s26  ;;  %s3409_s26 = smov 2  }
  0x67   : > { %847 = vperm.xlu0 %2343, %v642_v6   ;;  %v2786_v6 = vrot.slane %v2704_v11, %v2769_v53 }
  0x99   : > { %v648_v13 = vpop.permute.xlu1 %647  ;;  %v644_v14 = vpop.permute.xlu0 %643 }
  0x9a   : > { %v654_v17 = vsel %vm653_vm1, %v644_v14, %v648_v13  ;;  %v656_v18 = vsel %vm653_vm1, %v648_v13, %v644_v14 }
  0x9b   : > { %v666_v24 = vmul.f32 %v2714_v15, %v656_v18  ;;  %v667_v26 = vmul.f32 %v2718_v16, %v654_v17  ;;  %v2793_v17 = vsub.s32 5, %v2694_v8 }
  0x9d   : > { %v650_v19 = vpop.permute.xlu1 %649  ;;  %v646_v20 = vpop.permute.xlu0 %645 }
  0x9e   : > { %v655_v21 = vsel %vm653_vm1, %v646_v20, %v650_v19  ;;  %v657_v22 = vsel %vm653_vm1, %v650_v19, %v646_v20 }
  0x9f   : > { %v668_v25 = vmul.f32 %v2714_v15, %v657_v22  ;;  %v669_v27 = vmul.f32 %v2718_v16, %v655_v21 }
  0xa1   : > { %v673_v28 = vpop.permute.xlu1 %672  ;;  %v671_v29 = vpop.permute.xlu0 %670  ;;  %v2172_v30 = vpack.c.bf16 %v669_v27, %v667_v26  ;;  %v2174_v31 = vpack.c.bf16 %v668_v25, %v666_v24 }
  0xa3   : > { %2173 = vmatprep.subr.bf16.mxu0 %v2172_v30 }
  0xa4   : > { %2175 = vmatpush1.bf16.msra.mxu0 %v2174_v31  ;;  %v2188_v31 = vpack.c.bf16 %v2622_v2, %v2612_v0  ;;  %v2821_v0 = vsub.s32 6, %v2694_v8 }
  0xa5   : > { %v677_v34 = vpop.permute.xlu1 %676  ;;  %v675_v35 = vpop.permute.xlu0 %674 }
  0xa6   : > { %v680_v37 = vsel %vm678_vm2, %v673_v28, %v677_v34  ;;  %v682_v38 = vsel %vm678_vm2, %v677_v34, %v673_v28  ;;  %v679_v39 = vsel %vm678_vm2, %v671_v29, %v675_v35  ;;  %v681_v40 = vsel %vm678_vm2, %v675_v35, %v671_v29 }
  0xa7   : > { %v693_v41 = vmul.f32 %v2738_v32, %v682_v38  ;;  %v694_v42 = vmul.f32 %v2742_v33, %v680_v37  ;;  %v691_v43 = vmul.f32 %v2738_v32, %v681_v40  ;;  %v692_v44 = vmul.f32 %v2742_v33, %v679_v39 }
  0xa8   : > { %v2812_v34 = vrot.slane %v2704_v11, %v2793_v17  ;;  %v2816_v35 = vrot.slane %v2709_v12, %v2793_v17  ;;  %v2190_v37 = vpack.c.bf16 %v2625_v3, %v2615_v1 }
  0xa9   : > { %v698_v45 = vpop.permute.xlu1 %697  ;;  %v696_v46 = vpop.permute.xlu0 %695  ;;  %v2176_v47 = vpack.c.bf16 %v694_v42, %v692_v44  ;;  %v2178_v48 = vpack.c.bf16 %v693_v41, %v691_v43 }
  0xab   : > { %2177 = vmatprep.subr.bf16.mxu0 %v2176_v47 }
  0xac   : > { %2179 = vmatpush1.bf16.msra.mxu0 %v2178_v48 }
  0xad   : > { %v702_v51 = vpop.permute.xlu1 %701  ;;  %v700_v52 = vpop.permute.xlu0 %699 }
  0xae   : > { %v705_v54 = vsel %vm703_vm3, %v698_v45, %v702_v51  ;;  %v707_v55 = vsel %vm703_vm3, %v702_v51, %v698_v45  ;;  %v704_v56 = vsel %vm703_vm3, %v696_v46, %v700_v52  ;;  %v706_v57 = vsel %vm703_vm3, %v700_v52, %v696_v46 }
  0xaf   : > { %v718_v58 = vmul.f32 %v2762_v49, %v707_v55  ;;  %v719_v59 = vmul.f32 %v2766_v50, %v705_v54  ;;  %v716_v60 = vmul.f32 %v2762_v49, %v706_v57  ;;  %v717_v61 = vmul.f32 %v2766_v50, %v704_v56 }
  0xb0   : > { %v2838_v51 = vrot.slane %v2704_v11, %v2821_v0  ;;  %v2842_v52 = vrot.slane %v2709_v12, %v2821_v0  ;;  %v2845_v56 = vsub.s32 7, %v2694_v8 }
  0xb1   : > { %v723_v62 = vpop.permute.xlu1 %722  ;;  %v721_v63 = vpop.permute.xlu0 %720  ;;  %v2180_v4 = vpack.c.bf16 %v719_v59, %v717_v61  ;;  %v2182_v5 = vpack.c.bf16 %v718_v58, %v716_v60 }
  0xb3   : > { %2181 = vmatprep.subr.bf16.mxu0 %v2180_v4 }
  0xb4   : > { %2183 = vmatpush1.bf16.msra.mxu0 %v2182_v5 }
  0xb5   : > { %v727_v13 = vpop.permute.xlu1 %726  ;;  %v725_v14 = vpop.permute.xlu0 %724 }
  0xb6   : > { %v730_v18 = vsel %vm728_vm4, %v723_v62, %v727_v13  ;;  %v732_v19 = vsel %vm728_vm4, %v727_v13, %v723_v62  ;;  %v729_v20 = vsel %vm728_vm4, %v721_v63, %v725_v14  ;;  %v731_v21 = vsel %vm728_vm4, %v725_v14, %v721_v63 }
  0xb7   : > { %v743_v22 = vmul.f32 %v2786_v6, %v732_v19  ;;  %v744_v24 = vmul.f32 %v2790_v7, %v730_v18  ;;  %v741_v25 = vmul.f32 %v2786_v6, %v731_v21  ;;  %v742_v26 = vmul.f32 %v2790_v7, %v729_v20 }
  0xb8   : > { %v2862_v18 = vrot.slane %v2704_v11, %v2845_v56  ;;  %v2866_v19 = vrot.slane %v2709_v12, %v2845_v56 }
  0xb9   : > { %v748_v27 = vpop.permute.xlu1 %747  ;;  %v746_v28 = vpop.permute.xlu0 %745  ;;  %v2184_v29 = vpack.c.bf16 %v744_v24, %v742_v26  ;;  %v2186_v30 = vpack.c.bf16 %v743_v22, %v741_v25 }
  0xbb   : > { %2185 = vmatprep.subr.bf16.mxu0 %v2184_v29 }
  0xbc   : > { %2187 = vmatpush1.bf16.msra.mxu0 %v2186_v30 }
  0xbd   : > { %v752_v38 = vpop.permute.xlu1 %751  ;;  %v750_v39 = vpop.permute.xlu0 %749  ;;  %2189 = vmatprep.subr.bf16.mxu0 %v2188_v31 }
  0xbe   : > { %v755_v2 = vsel %vm753_vm5, %v748_v27, %v752_v38  ;;  %v757_v40 = vsel %vm753_vm5, %v752_v38, %v748_v27  ;;  %v754_v41 = vsel %vm753_vm5, %v746_v28, %v750_v39  ;;  %v756_v42 = vsel %vm753_vm5, %v750_v39, %v746_v28  ;;  %v2884_v38 = vld [vmem:[%s3405_s30 + $0x10] ss:$0 sm:$0xff]  ;;  %v2889_v39 = vld [vmem:[%s3405_s30 + $0x18] ss:$0 sm:$0xff] }
  0xbf   : > { %v768_v1 = vmul.f32 %v2812_v34, %v755_v2  ;;  %v769_v3 = vmul.f32 %v2816_v35, %v757_v40  ;;  %v766_v43 = vmul.f32 %v2812_v34, %v754_v41  ;;  %v767_v44 = vmul.f32 %v2816_v35, %v756_v42 }
  0xc0   : > { %2191 = vmatpush1.bf16.msra.mxu0 %v2190_v37 }
  0xc1   : > { %v773_v45 = vpop.permute.xlu1 %772  ;;  %v771_v46 = vpop.permute.xlu0 %770  ;;  %v2192_v47 = vpack.c.bf16 %v769_v3, %v767_v44  ;;  %v2194_v48 = vpack.c.bf16 %v768_v1, %v766_v43 }
  0xc3   : > { %2193 = vmatprep.subr.bf16.mxu0 %v2192_v47 }
  0xc4   : > { %2195 = vmatpush1.bf16.msra.mxu0 %v2194_v48 }
  0xc5   : > { %v777_v54 = vpop.permute.xlu1 %776  ;;  %v775_v55 = vpop.permute.xlu0 %774 }
  0xc6   : > { %v780_v57 = vsel %vm778_vm6, %v773_v45, %v777_v54  ;;  %v782_v58 = vsel %vm778_vm6, %v777_v54, %v773_v45  ;;  %v779_v59 = vsel %vm778_vm6, %v771_v46, %v775_v55  ;;  %v781_v60 = vsel %vm778_vm6, %v775_v55, %v771_v46  ;;  %v640_v54 = vld [vmem:[%s3403_s6] sm:$0xff]  ;;  %s3412_s6 = smov 96  }
  0xc7   : > { %v793_v61 = vmul.f32 %v2838_v51, %v780_v57  ;;  %v794_v62 = vmul.f32 %v2842_v52, %v782_v58  ;;  %v791_v63 = vmul.f32 %v2838_v51, %v779_v59  ;;  %v792_v8 = vmul.f32 %v2842_v52, %v781_v60 }
  0xc9   : > { %v798_v4 = vpop.permute.xlu1 %797  ;;  %v796_v5 = vpop.permute.xlu0 %795  ;;  %v2196_v13 = vpack.c.bf16 %v794_v62, %v792_v8  ;;  %v2198_v14 = vpack.c.bf16 %v793_v61, %v791_v63  ;;  %v928_v63 = vld [vmem:[%s3414_s9] sm:$0xff]  ;;  %v2438_v8 = vmov 0.0   ;;  %s620_s9 = sand.u32 1, %s2419_s22  }
  0xca   : > { %1066 = vmatprep.mubr.f32.mxu1 %v2438_v8 }
  0xcb   : > { %2197 = vmatprep.subr.bf16.mxu0 %v2196_v13 }
  0xcc   : > { %2199 = vmatpush1.bf16.msra.mxu0 %v2198_v14 }
  0xcd   : > { %v802_v20 = vpop.permute.xlu1 %801  ;;  %v800_v21 = vpop.permute.xlu0 %799 }
  0xce   : > { %v805_v22 = vsel %vm803_vm7, %v798_v4, %v802_v20  ;;  %v807_v24 = vsel %vm803_vm7, %v802_v20, %v798_v4  ;;  %v804_v25 = vsel %vm803_vm7, %v796_v5, %v800_v21  ;;  %v806_v11 = vsel %vm803_vm7, %v800_v21, %v796_v5 }
  0xcf   : > { %v818_v26 = vmul.f32 %v2862_v18, %v805_v22  ;;  %v819_v12 = vmul.f32 %v2866_v19, %v807_v24  ;;  %v816_v27 = vmul.f32 %v2862_v18, %v804_v25  ;;  %v817_v28 = vmul.f32 %v2866_v19, %v806_v11 }
  0xd1   : > { %v823_v29 = vpop.permute.xlu1 %822  ;;  %v821_v30 = vpop.permute.xlu0 %820  ;;  %v2200_v31 = vpack.c.bf16 %v819_v12, %v817_v28  ;;  %v2202_v37 = vpack.c.bf16 %v818_v26, %v816_v27 }
  0xd3   : > { %2201 = vmatprep.subr.bf16.mxu0 %v2200_v31 }
  0xd4   : > { %2203 = vmatpush1.bf16.msra.mxu0 %v2202_v37 }
  0xd5   : > { %v827_v2 = vpop.permute.xlu1 %826  ;;  %v825_v40 = vpop.permute.xlu0 %824 }
  0xd6   : > { %v830_v41 = vsel %vm828_vm8, %v823_v29, %v827_v2  ;;  %v832_v42 = vsel %vm828_vm8, %v827_v2, %v823_v29  ;;  %v829_v1 = vsel %vm828_vm8, %v821_v30, %v825_v40  ;;  %v831_v3 = vsel %vm828_vm8, %v825_v40, %v821_v30 }
  0xd7   : > { %v843_v43 = vmul.f32 %v2884_v38, %v830_v41  ;;  %v844_v44 = vmul.f32 %v2889_v39, %v832_v42  ;;  %v841_v45 = vmul.f32 %v2884_v38, %v829_v1  ;;  %v842_v46 = vmul.f32 %v2889_v39, %v831_v3 }
  0xd9   : > { %v2204_v47 = vpack.c.bf16 %v844_v44, %v842_v46  ;;  %v2206_v48 = vpack.c.bf16 %v843_v43, %v841_v45 }
  0xdb   : > { %2205 = vmatprep.subr.bf16.mxu0 %v2204_v47 }
  0xdc   : > { %2207 = vmatpush1.bf16.msra.mxu0 %v2206_v48 }
  0xdf   : > { %919 = vmatmul.mubr.f32.vlgmr.msra.gmra.mrb[0].mxu0 %v640_v54 }
  0xe0   : > { %1379 = vmatprep.mubr.f32.mxu0 %v2438_v8 }
  0xe6   : > { %v848_v55 = vpop.permute.xlu0 %847 }
 0x1b2   : > { %v920_v57 = vpop.f32.mrb[0].mxu0 }
 0x1b3   : > { %v921_v58 = vadd.f32 %v920_v57, %v848_v55  ;;  %v922_v59 = vpop.f32.mrb[1].mxu0 }
 0x1b4   : > { %v923_v61 = vadd.f32 %v922_v59, %v848_v55 }
 0x1b5   : > { %v2906_v60 = vmax.f32 %v921_v58, 0.0 }
 0x1b6   : > { %v2912_v62 = vmax.f32 %v923_v61, 0.0 }
 0x1b7   : > { %937 = vrot.lane.b32.xlu0 %v2906_v60, %s3406_s23  ;;  %929 = vrot.lane.b32.xlu1 %v2906_v60, %s3407_s28 }
 0x1bb   : > { %945 = vrot.lane.b32.xlu0 %v2906_v60, %s3408_s21  ;;  %931 = vrot.lane.b32.xlu1 %v2912_v62, %s3407_s28  ;;  %s3413_s28 = smov 94  }
 0x1bf   : > { %953 = vrot.lane.b32.xlu0 %v2906_v60, %s3409_s26  ;;  %939 = vrot.lane.b32.xlu1 %v2912_v62, %s3406_s23  ;;  %s2442_s23 = smov 1  }
 0x1c3   : > { %961 = vrot.lane.b32.xlu0 %v2906_v60, %s3410_s0  ;;  %947 = vrot.lane.b32.xlu1 %v2912_v62, %s3408_s21  ;;  %s2443_s21 = smov 127  }
 0x1c7   : > { %969 = vrot.lane.b32.xlu0 %v2906_v60, %s3411_s25  ;;  %955 = vrot.lane.b32.xlu1 %v2912_v62, %s3409_s26  ;;  %s3385_s26 = smov 112  }
 0x1cb   : > { %977 = vrot.lane.b32.xlu0 %v2906_v60, %s3412_s6  ;;  %963 = vrot.lane.b32.xlu1 %v2912_v62, %s3410_s0  ;;  %s2439_s0 = smov 17  }
 0x1cf   : > { %985 = vrot.lane.b32.xlu0 %v2906_v60, %s3413_s28  ;;  %971 = vrot.lane.b32.xlu1 %v2912_v62, %s3411_s25  ;;  %s3384_s25 = smov 16  }
 0x1d3   : > { %995 = vperm.xlu0 %2343, %v928_v63   ;;  %979 = vrot.lane.b32.xlu1 %v2912_v62, %s3412_s6  ;;  %s2444_s6 = smov 113  }
 0x1d7   : > { %987 = vrot.lane.b32.xlu1 %v2912_v62, %s3413_s28  ;;  %s2441_s28 = smov 15  }
 0x229   : > { %v938_v4 = vpop.permute.xlu0 %937  ;;  %v930_v5 = vpop.permute.xlu1 %929 }
 0x22d   : > { %v946_v13 = vpop.permute.xlu0 %945  ;;  %v932_v14 = vpop.permute.xlu1 %931 }
 0x22e   : > { %v933_v20 = vsel %vm653_vm1, %v930_v5, %v932_v14  ;;  %v934_v21 = vsel %vm653_vm1, %v932_v14, %v930_v5  ;;  %vm1183_vm1 = vcmp.lt.s32.totalorder %v2696_v9, 112 }
 0x22f   : > { %v935_v26 = vmul.f32 %v934_v21, %v2714_v15  ;;  %v936_v27 = vmul.f32 %v933_v20, %v2718_v16 }
 0x231   : > { %v954_v22 = vpop.permute.xlu0 %953  ;;  %v940_v24 = vpop.permute.xlu1 %939 }
 0x232   : > { %v941_v25 = vsel %vm678_vm2, %v938_v4, %v940_v24  ;;  %v942_v11 = vsel %vm678_vm2, %v940_v24, %v938_v4  ;;  %vm1200_vm2 = vcmp.lt.s32.totalorder %v2696_v9, 111 }
 0x233   : > { %v943_v12 = vmul.f32 %v942_v11, %v2738_v32  ;;  %v944_v28 = vmul.f32 %v941_v25, %v2742_v33 }
 0x235   : > { %v948_v29 = vpop.permute.xlu1 %947  ;;  %v2208_v30 = vpack.c.bf16 %v944_v28, %v936_v27  ;;  %v2210_v31 = vpack.c.bf16 %v943_v12, %v935_v26  ;;  %v962_v37 = vpop.permute.xlu0 %961  ;;  %v1500_v26 = vld [vmem:[%s3357_s15] sm:$0xff] }
 0x236   : > { %v949_v2 = vsel %vm703_vm3, %v946_v13, %v948_v29  ;;  %v950_v40 = vsel %vm703_vm3, %v948_v29, %v946_v13  ;;  %v1586_v12 = vld [vmem:[%s3359_s17] sm:$0xff]  ;;  %v1297_v29 = vld [vmem:[%s3355_s13 + $0x8] sm:$0xff]  ;;  %vm1308_vm3 = vcmask 64512  }
 0x237   : > { %2209 = vmatprep.subr.bf16.mxu1 %v2208_v30  ;;  %v951_v32 = vmul.f32 %v950_v40, %v2762_v49  ;;  %v952_v33 = vmul.f32 %v949_v2, %v2766_v50  ;;  %v1693_v27 = vld [vmem:[%s3361_s19] sm:$0xff] }
 0x238   : > { %2211 = vmatpush1.bf16.msra.mxu1 %v2210_v31  ;;  %v1076_v28 = vld [vmem:[%s3416_s11] sm:$0xff] }
 0x239   : > { %v956_v41 = vpop.permute.xlu1 %955  ;;  %v970_v3 = vpop.permute.xlu0 %969  ;;  %v3047_v30 = vld [vmem:[%s3417_s7] sm:$0xff] }
 0x23a   : > { %v957_v15 = vsel %vm728_vm4, %v954_v22, %v956_v41  ;;  %v958_v16 = vsel %vm728_vm4, %v956_v41, %v954_v22  ;;  %v1087_v40 = vrot.slane %v3047_v30, %v2699_v10  ;;  %vm2448_vm4 = vmmov 0  }
 0x23b   : > { %v959_v42 = vmul.f32 %v958_v16, %v2786_v6  ;;  %v960_v1 = vmul.f32 %v957_v15, %v2790_v7  ;;  %v1104_v15 = vrot.slane %v3047_v30, %v2729_v23 }
 0x23d   : > { %v964_v43 = vpop.permute.xlu1 %963  ;;  %v2212_v44 = vpack.c.bf16 %v960_v1, %v952_v33  ;;  %v2214_v45 = vpack.c.bf16 %v959_v42, %v951_v32  ;;  %v978_v54 = vpop.permute.xlu0 %977 }
 0x23e   : > { %v965_v46 = vsel %vm753_vm5, %v962_v37, %v964_v43  ;;  %v966_v47 = vsel %vm753_vm5, %v964_v43, %v962_v37  ;;  %v3052_v37 = vld [vmem:[%s3417_s7 + $0x8] sm:$0xff] }
 0x23f   : > { %v967_v48 = vmul.f32 %v965_v46, %v2812_v34  ;;  %v968_v49 = vmul.f32 %v966_v47, %v2816_v35  ;;  %2213 = vmatprep.subr.bf16.mxu1 %v2212_v44  ;;  %v1091_v41 = vrot.slane %v3052_v37, %v2699_v10  ;;  %v1108_v16 = vrot.slane %v3052_v37, %v2729_v23 }
 0x240   : > { %2215 = vmatpush1.bf16.msra.mxu1 %v2214_v45  ;;  %v1125_v23 = vrot.slane %v3052_v37, %v2745_v36 }
 0x241   : > { %v972_v50 = vpop.permute.xlu1 %971  ;;  %v2216_v6 = vpack.c.bf16 %v968_v49, %v2912_v62  ;;  %v2218_v7 = vpack.c.bf16 %v967_v48, %v2906_v60  ;;  %v986_v63 = vpop.permute.xlu0 %985 }
 0x242   : > { %v973_v55 = vsel %vm778_vm6, %v970_v3, %v972_v50  ;;  %v974_v57 = vsel %vm778_vm6, %v972_v50, %v970_v3 }
 0x243   : > { %2217 = vmatprep.subr.bf16.mxu1 %v2216_v6  ;;  %v975_v59 = vmul.f32 %v973_v55, %v2838_v51  ;;  %v976_v60 = vmul.f32 %v974_v57, %v2842_v52  ;;  %v927_v52 = vld [vmem:[%s3415_s8] sm:$0xff]  ;;  %v1121_v6 = vrot.slane %v3047_v30, %v2745_v36  ;;  %v1155_v36 = vrot.slane %v3047_v30, %v2793_v17  ;;  %s3419_s8 = sld [smem:[#allocation10_spill]] }
 0x244   : > { %2219 = vmatpush1.bf16.msra.mxu1 %v2218_v7  ;;  %v1138_v7 = vrot.slane %v3047_v30, %v2769_v53 }
 0x245   : > { %v980_v58 = vpop.permute.xlu1 %979 }
 0x246   : > { %v981_v34 = vsel %vm803_vm7, %v978_v54, %v980_v58  ;;  %v982_v35 = vsel %vm803_vm7, %v980_v58, %v978_v54  ;;  %v1142_v54 = vrot.slane %v3052_v37, %v2769_v53 }
 0x247   : > { %v983_v61 = vmul.f32 %v981_v34, %v2862_v18  ;;  %v984_v62 = vmul.f32 %v982_v35, %v2866_v19 }
 0x249   : > { %v988_v4 = vpop.permute.xlu1 %987  ;;  %v2220_v5 = vpack.c.bf16 %v984_v62, %v976_v60  ;;  %v2222_v13 = vpack.c.bf16 %v983_v61, %v975_v59  ;;  %v1159_v60 = vrot.slane %v3052_v37, %v2793_v17 }
 0x24a   : > { %v990_v14 = vsel %vm828_vm8, %v988_v4, %v986_v63  ;;  %v989_v20 = vsel %vm828_vm8, %v986_v63, %v988_v4 }
 0x24b   : > { %v992_v21 = vmul.f32 %v2889_v39, %v990_v14  ;;  %2221 = vmatprep.subr.bf16.mxu1 %v2220_v5  ;;  %v991_v51 = vmul.f32 %v2884_v38, %v989_v20  ;;  %v1296_v38 = vld [vmem:[%s3355_s13] sm:$0xff] }
 0x24c   : > { %2223 = vmatpush1.bf16.msra.mxu1 %v2222_v13 }
 0x24d   : > { %1018 = vmatprep.subr.mxu1 %v992_v21 }
 0x250   : > { %1019 = vmatpush1.msra.mxu1 %v991_v51 }
 0x251   : > { %2082 = vmatmul.mubr.msk.f32.vlgmr.msra.gmra.mrb[0].mxu1 %vm998_vm9, %v927_v52 }
 0x252   : > { %1285 = vmatprep.mubr.f32.mxu1 %v2438_v8  ;;  %v996_v18 = vpop.permute.xlu0 %995 }
 0x324   : > { %v1068_v19 = vpop.f32.mrb[0].mxu1 }
 0x325   : > { %v1069_v22 = vadd.f32 %v1068_v19, %v996_v18  ;;  %v1070_v24 = vpop.f32.mrb[1].mxu1 }
 0x326   : > { %v1071_v39 = vadd.f32 %v1070_v24, %v996_v18  ;;  %v1172_v24 = vrot.slane %v3047_v30, %v2821_v0 }
 0x327   : > { %v3002_v25 = vmax.f32 %v1069_v22, 0.0 }
 0x328   : > { %v3004_v11 = vmax.f32 %v1071_v39, 0.0  ;;  %v1176_v39 = vrot.slane %v3052_v37, %v2821_v0 }
 0x329   : > { %1077 = vrot.lane.b32.xlu1 %v3002_v25, %s2439_s0 }
 0x32a   : > { %1079 = vrot.lane.b32.xlu0 %v3004_v11, %s2439_s0  ;;  %s2446_s0 = smov 111  }
 0x32d   : > { %1094 = vrot.lane.b32.xlu1 %v3002_v25, %s3384_s25 }
 0x32e   : > { %1096 = vrot.lane.b32.xlu0 %v3004_v11, %s3384_s25 }
 0x331   : > { %1111 = vrot.lane.b32.xlu1 %v3002_v25, %s2441_s28 }
 0x332   : > { %1113 = vrot.lane.b32.xlu0 %v3004_v11, %s2441_s28 }
 0x335   : > { %1128 = vrot.lane.b32.xlu1 %v3002_v25, %s2442_s23 }
 0x336   : > { %1130 = vrot.lane.b32.xlu0 %v3004_v11, %s2442_s23  ;;  %s3420_s23 = smov 112  }
 0x339   : > { %1145 = vrot.lane.b32.xlu1 %v3002_v25, %s2443_s21 }
 0x33a   : > { %1147 = vrot.lane.b32.xlu0 %v3004_v11, %s2443_s21 }
 0x33d   : > { %1162 = vrot.lane.b32.xlu1 %v3002_v25, %s2444_s6 }
 0x33e   : > { %1164 = vrot.lane.b32.xlu0 %v3004_v11, %s2444_s6 }
 0x341   : > { %1179 = vrot.lane.b32.xlu1 %v3002_v25, %s3385_s26 }
 0x342   : > { %1181 = vrot.lane.b32.xlu0 %v3004_v11, %s3385_s26  ;;  %s2076_s26 = sshll.u32 %s620_s9, 5 }
 0x343   : > { %s622_s11 = scalar_lea.vmem [#allocation2], %s2076_s26 }
 0x344   : > { %s2010_s28 = sshll.u32 %s622_s11, 4  ;;  %s3296_s28 = int_to_ptr.vmem [resolvable:$true] %s2010_s28 }
 0x345   : > { %1196 = vrot.lane.b32.xlu1 %v3002_v25, %s2446_s0  ;;  %s2365_s21 = scalar_lea.vmem %s3296_s28, 512 }
 0x346   : > { %1198 = vrot.lane.b32.xlu0 %v3004_v11, %s2446_s0  ;;  %s2107_s0 = sshll.u32 %s2577_s2, 9  ;;  %s3300_s2 = scalar_lea.sflag [#allocation3], %s620_s9 }
 0x347   : > { %s3294_s25 = scalar_lea.hbm %s3362_s20, %s2107_s0  ;;  %p2366_p11 = scmp.ne.s32.totalorder %s3296_s28, %s2365_s21 }
 0x349   : > { %1215 = vperm.xlu1 %2344, %v1076_v28   ;;  %p2367_p12 = pnand %p2366_p11, %p2594_p5 }
 0x34a   : > { %1300 = vperm.xlu0 %2343, %v1296_v38   ;;  %v1189_v38 = vrot.slane %v3047_v30, %v2845_v56  ;;  %v2084_v30 = vld [vmem:[%s3417_s7 + $0x18] ss:$0 sm:$0xff] }
 0x34b   : > { %p2368_p13 = pneg %p2367_p12 }
 0x34d   : > { %1305 = vperm.xlu1 %2344, %v1297_v29  }
 0x34e   : > { %1503 = vperm.xlu0 %2343, %v1500_v26  }
 0x352   : > { %1590 = vperm.xlu0 %2343, %v1586_v12  }
 0x356   : > { %1697 = vperm.xlu0 %2343, %v1693_v27  }
 0x39b   : > { %v1078_v31 = vpop.permute.xlu1 %1077 }
 0x39c   : > { %v1080_v2 = vpop.permute.xlu0 %1079 }
 0x39d   : > { %v1082_v32 = vsel %vm1081_vm10, %v1078_v31, %v1080_v2  ;;  %v1083_v33 = vsel %vm1081_vm10, %v1080_v2, %v1078_v31 }
 0x39e   : > { %v1092_v44 = vmul.f32 %v1087_v40, %v1083_v33  ;;  %v1093_v45 = vmul.f32 %v1091_v41, %v1082_v32  ;;  %v2083_v32 = vld [vmem:[%s3417_s7 + $0x10] ss:$0 sm:$0xff]  ;;  %s3421_s7 = sld [smem:[#allocation11_spill]] }
 0x39f   : > { %v1095_v42 = vpop.permute.xlu1 %1094 }
 0x3a0   : > { %v1097_v1 = vpop.permute.xlu0 %1096 }
 0x3a1   : > { %v1099_v3 = vsel %vm1098_vm11, %v1095_v42, %v1097_v1  ;;  %v1100_v43 = vsel %vm1098_vm11, %v1097_v1, %v1095_v42  ;;  %v1075_v1 = vld [vmem:[%s3418_s10] sm:$0xff] }
 0x3a2   : > { %v1109_v46 = vmul.f32 %v1104_v15, %v1100_v43  ;;  %v1110_v47 = vmul.f32 %v1108_v16, %v1099_v3  ;;  %v1408_v3 = vld [vmem:[%s3419_s8 + $0x80] sm:$0xff]  ;;  %v1409_v43 = vld [vmem:[%s3419_s8 + $0x88] sm:$0xff] }
 0x3a3   : > { %v1112_v48 = vpop.permute.xlu1 %1111 }
 0x3a4   : > { %v2226_v10 = vpack.c.bf16 %v1109_v46, %v1092_v44  ;;  %v1114_v49 = vpop.permute.xlu0 %1113  ;;  %v2224_v50 = vpack.c.bf16 %v1110_v47, %v1093_v45  ;;  %v1392_v44 = vld [vmem:[%s3419_s8] sm:$0xff]  ;;  %v2240_v45 = vpack.c.bf16 %v1409_v43, %v1408_v3  ;;  %v1393_v46 = vld [vmem:[%s3419_s8 + $0x8] sm:$0xff]  ;;  %v1410_v47 = vld [vmem:[%s3419_s8 + $0x90] sm:$0xff] }
 0x3a5   : > { %v1116_v55 = vsel %vm1115_vm12, %v1112_v48, %v1114_v49  ;;  %v1117_v57 = vsel %vm1115_vm12, %v1114_v49, %v1112_v48  ;;  %v1411_v48 = vld [vmem:[%s3419_s8 + $0x98] sm:$0xff] }
 0x3a6   : > { %2225 = vmatprep.subr.bf16.mxu1 %v2224_v50  ;;  %v1126_v61 = vmul.f32 %v1121_v6, %v1117_v57  ;;  %v1127_v62 = vmul.f32 %v1125_v23, %v1116_v55  ;;  %v2244_v49 = vpack.c.bf16 %v1411_v48, %v1410_v47  ;;  %v1394_v50 = vld [vmem:[%s3419_s8 + $0x10] sm:$0xff]  ;;  %v1395_v6 = vld [vmem:[%s3419_s8 + $0x18] sm:$0xff]  ;;  %v1412_v23 = vld [vmem:[%s3419_s8 + $0xa0] sm:$0xff] }
 0x3a7   : > { %2227 = vmatpush1.bf16.msra.mxu1 %v2226_v10  ;;  %v1129_v58 = vpop.permute.xlu1 %1128  ;;  %v2242_v10 = vpack.c.bf16 %v1393_v46, %v1392_v44  ;;  %v1396_v57 = vld [vmem:[%s3419_s8 + $0x20] sm:$0xff]  ;;  %v2447_v46 = vmov 0.0|0.0  }
 0x3a8   : > { %v1131_v34 = vpop.permute.xlu0 %1130 }
 0x3a9   : > { %v1133_v35 = vsel %vm1132_vm13, %v1129_v58, %v1131_v34  ;;  %v1134_v59 = vsel %vm1132_vm13, %v1131_v34, %v1129_v58  ;;  %v1397_v58 = vld [vmem:[%s3419_s8 + $0x28] sm:$0xff]  ;;  %v1414_v34 = vld [vmem:[%s3419_s8 + $0xb0] sm:$0xff] }
 0x3aa   : > { %v1143_v63 = vmul.f32 %v1138_v7, %v1134_v59  ;;  %v1144_v4 = vmul.f32 %v1142_v54, %v1133_v35  ;;  %v1413_v7 = vld [vmem:[%s3419_s8 + $0xa8] sm:$0xff]  ;;  %v2246_v54 = vpack.c.bf16 %v1395_v6, %v1394_v50  ;;  %v1415_v35 = vld [vmem:[%s3419_s8 + $0xb8] sm:$0xff]  ;;  %v2250_v59 = vpack.c.bf16 %v1397_v58, %v1396_v57 }
 0x3ab   : > { %v1146_v53 = vpop.permute.xlu1 %1145  ;;  %v2248_v55 = vpack.c.bf16 %v1413_v7, %v1412_v23  ;;  %v1499_v7 = vld [vmem:[%s3356_s14] sm:$0xff] }
 0x3ac   : > { %v2230_v5 = vpack.c.bf16 %v1143_v63, %v1126_v61  ;;  %v1148_v13 = vpop.permute.xlu0 %1147  ;;  %v2228_v14 = vpack.c.bf16 %v1144_v4, %v1127_v62  ;;  %v1399_v61 = vld [vmem:[%s3419_s8 + $0x38] sm:$0xff]  ;;  %v1416_v62 = vld [vmem:[%s3419_s8 + $0xc0] sm:$0xff]  ;;  %v1417_v63 = vld [vmem:[%s3419_s8 + $0xc8] sm:$0xff] }
 0x3ad   : > { %v1150_v20 = vsel %vm1149_vm14, %v1146_v53, %v1148_v13  ;;  %v1151_v21 = vsel %vm1149_vm14, %v1148_v13, %v1146_v53  ;;  %v2256_v53 = vpack.c.bf16 %v1417_v63, %v1416_v62  ;;  %v1401_v13 = vld [vmem:[%s3419_s8 + $0x48] sm:$0xff]  ;;  %v1691_v63 = vld [vmem:[%s3360_s18] sm:$0xff] }
 0x3ae   : > { %v1160_v51 = vmul.f32 %v1155_v36, %v1150_v20  ;;  %v1161_v52 = vmul.f32 %v1159_v60, %v1151_v21  ;;  %2229 = vmatprep.subr.bf16.mxu1 %v2228_v14  ;;  %v2252_v36 = vpack.c.bf16 %v1415_v35, %v1414_v34  ;;  %v1398_v60 = vld [vmem:[%s3419_s8 + $0x30] sm:$0xff]  ;;  %v1419_v20 = vld [vmem:[%s3419_s8 + $0xd8] sm:$0xff]  ;;  %v1585_v62 = vld [vmem:[%s3358_s16 + $0x8] sm:$0xff] }
 0x3af   : > { %2231 = vmatpush1.bf16.msra.mxu1 %v2230_v5  ;;  %v1163_v18 = vpop.permute.xlu1 %1162  ;;  %v2254_v4 = vpack.c.bf16 %v1399_v61, %v1398_v60  ;;  %v1400_v5 = vld [vmem:[%s3419_s8 + $0x40] sm:$0xff]  ;;  %v1418_v14 = vld [vmem:[%s3419_s8 + $0xd0] sm:$0xff] }
 0x3b0   : > { %v2234_v19 = vpack.c.bf16 %v1160_v51, %v3002_v25  ;;  %v1165_v17 = vpop.permute.xlu0 %1164  ;;  %v2232_v22 = vpack.c.bf16 %v1161_v52, %v3004_v11  ;;  %v1193_v25 = vrot.slane %v3052_v37, %v2845_v56  ;;  %v2258_v21 = vpack.c.bf16 %v1401_v13, %v1400_v5  ;;  %v1402_v52 = vld [vmem:[%s3419_s8 + $0x50] sm:$0xff]  ;;  %v1803_v5 = vld [vmem:[%s3421_s7 + $0x8] sm:$0xff]  ;;  %v1805_v13 = vld [vmem:[%s3421_s7 + $0x18] sm:$0xff] }
 0x3b1   : > { %v1167_v26 = vsel %vm1166_vm15, %v1163_v18, %v1165_v17  ;;  %v1168_v12 = vsel %vm1166_vm15, %v1165_v17, %v1163_v18  ;;  %v2260_v51 = vpack.c.bf16 %v1419_v20, %v1418_v14  ;;  %v1403_v18 = vld [vmem:[%s3419_s8 + $0x58] sm:$0xff]  ;;  %v1421_v17 = vld [vmem:[%s3419_s8 + $0xe8] sm:$0xff]  ;;  %v1802_v14 = vld [vmem:[%s3421_s7] sm:$0xff] }
 0x3b2   : > { %2233 = vmatprep.subr.bf16.mxu1 %v2232_v22  ;;  %v1177_v31 = vmul.f32 %v1172_v24, %v1167_v26  ;;  %v1178_v0 = vmul.f32 %v1176_v39, %v1168_v12  ;;  %v2262_v22 = vpack.c.bf16 %v1403_v18, %v1402_v52  ;;  %v1404_v39 = vld [vmem:[%s3419_s8 + $0x60] sm:$0xff]  ;;  %v1804_v20 = vld [vmem:[%s3421_s7 + $0x10] sm:$0xff]  ;;  %v1692_v52 = vld [vmem:[%s3360_s18 + $0x8] sm:$0xff] }
 0x3b3   : > { %2235 = vmatpush1.bf16.msra.mxu1 %v2234_v19  ;;  %v1180_v27 = vpop.permute.xlu1 %1179  ;;  %v1420_v19 = vld [vmem:[%s3419_s8 + $0xe0] sm:$0xff]  ;;  %v2277_v18 = vpack.c.bf16 %v1804_v20, %v1802_v14 }
 0x3b4   : > { %v1182_v11 = vpop.permute.xlu0 %1181  ;;  %v2264_v24 = vpack.c.bf16 %v1421_v17, %v1420_v19 }
 0x3b5   : > { %v1184_v28 = vsel %vm1183_vm1, %v1180_v27, %v1182_v11  ;;  %v1185_v29 = vsel %vm1183_vm1, %v1182_v11, %v1180_v27 }
 0x3b6   : > { %v1194_v2 = vmul.f32 %v1189_v38, %v1184_v28  ;;  %v1195_v40 = vmul.f32 %v1193_v25, %v1185_v29  ;;  %v1405_v38 = vld [vmem:[%s3419_s8 + $0x68] sm:$0xff] }
 0x3b7   : > { %v1197_v41 = vpop.permute.xlu1 %1196  ;;  %v2266_v25 = vpack.c.bf16 %v1405_v38, %v1404_v39 }
 0x3b8   : > { %v2238_v15 = vpack.c.bf16 %v1194_v2, %v1177_v31  ;;  %v1199_v56 = vpop.permute.xlu0 %1198  ;;  %v2236_v37 = vpack.c.bf16 %v1195_v40, %v1178_v0  ;;  %v1294_v0 = vld [vmem:[%s3354_s12] sm:$0xff]  ;;  %v1295_v2 = vld [vmem:[%s3354_s12 + $0x8] sm:$0xff]  ;;  %v1422_v40 = vld [vmem:[%s3419_s8 + $0xf0] sm:$0xff] }
 0x3b9   : > { %v1202_v16 = vsel %vm1200_vm2, %v1199_v56, %v1197_v41  ;;  %v1201_v33 = vsel %vm1200_vm2, %v1197_v41, %v1199_v56  ;;  %v1423_v41 = vld [vmem:[%s3419_s8 + $0xf8] sm:$0xff] }
 0x3ba   : > { %v1212_v42 = vmul.f32 %v2084_v30, %v1202_v16  ;;  %2237 = vmatprep.subr.bf16.mxu1 %v2236_v37  ;;  %v1211_v9 = vmul.f32 %v2083_v32, %v1201_v33  ;;  %v2268_v30 = vpack.c.bf16 %v1423_v41, %v1422_v40  ;;  %v1407_v56 = vld [vmem:[%s3419_s8 + $0x78] sm:$0xff]  ;;  %v1891_v40 = vld [vmem:[%s3347_s5 + $0x10] sm:$0xff] }
 0x3bb   : > { %2239 = vmatpush1.bf16.msra.mxu1 %v2238_v15  ;;  %v1406_v15 = vld [vmem:[%s3419_s8 + $0x70] sm:$0xff] }
 0x3bc   : > { %1237 = vmatprep.subr.mxu1 %v1212_v42  ;;  %v2270_v37 = vpack.c.bf16 %v1407_v56, %v1406_v15 }
 0x3bf   : > { %1238 = vmatpush1.msra.mxu1 %v1211_v9 }
 0x3c0   : > { %2085 = vmatmul.mubr.msk.f32.vlgmr.msra.gmra.mrb[2].mxu1 %vm998_vm9, %v1075_v1  ;;  %2241 = vmatprep.subr.bf16.mxu1 %v2240_v45 }
 0x3c1   : > { %2243 = vmatpush3.bf16.msra.mxu1 %v2242_v10 }
 0x3c2   : > { %2245 = vmatprep.subr.bf16.mxu1 %v2244_v49 }
 0x3c5   : > { %2247 = vmatpush3.bf16.msra.mxu1 %v2246_v54  ;;  %v1584_v54 = vld [vmem:[%s3358_s16] sm:$0xff] }
 0x3c6   : > { %2249 = vmatprep.subr.bf16.mxu1 %v2248_v55 }
 0x3c8   : > { %v1216_v26 = vpop.permute.xlu1 %1215 }
 0x3c9   : > { %2251 = vmatpush3.bf16.msra.mxu1 %v2250_v59  ;;  %v1301_v32 = vpop.permute.xlu0 %1300 }
 0x3ca   : > { %2253 = vmatprep.subr.bf16.mxu1 %v2252_v36 }
 0x3cc   : > { %v1306_v3 = vpop.permute.xlu1 %1305 }
 0x3cd   : > { %2255 = vmatpush3.bf16.msra.mxu1 %v2254_v4  ;;  %v1504_v55 = vpop.permute.xlu0 %1503  ;;  %v1587_v4 = vld [vmem:[%s3359_s17 + $0x8] sm:$0xff] }
 0x3ce   : > { %2257 = vmatprep.subr.bf16.mxu1 %v2256_v53  ;;  %v1694_v53 = vld [vmem:[%s3361_s19 + $0x8] sm:$0xff] }
 0x3d1   : > { %2259 = vmatpush3.bf16.msra.mxu1 %v2258_v21  ;;  %v2275_v21 = vpack.c.bf16 %v1805_v13, %v1803_v5 }
 0x3d2   : > { %2261 = vmatprep.subr.bf16.mxu1 %v2260_v51 }
 0x3d5   : > { %2263 = vmatpush3.bf16.msra.mxu1 %v2262_v22  ;;  %v1591_v22 = vpop.permute.xlu0 %1590 }
 0x3d6   : > { %2265 = vmatprep.subr.bf16.mxu1 %v2264_v24 }
 0x3d9   : > { %2267 = vmatpush3.bf16.msra.mxu1 %v2266_v25 }
 0x3da   : > { %2269 = vmatprep.subr.bf16.mxu1 %v2268_v30 }
 0x3dd   : > { %2271 = vmatpush3.bf16.msra.mxu1 %v2270_v37 }
 0x493   : > { %v1287_v12 = vpop.f32.mrb[2].mxu1 }
 0x494   : > { %v1288_v27 = vadd.f32 %v1287_v12, %v1216_v26  ;;  %v1289_v11 = vpop.f32.mrb[3].mxu1  ;;  %v1890_v12 = vld [vmem:[%s3347_s5 + $0x8] sm:$0xff] }
 0x495   : > { %v1290_v28 = vadd.f32 %v1289_v11, %v1216_v26 }
 0x496   : > { %v1292_v31 = vmax.f32 %v1288_v27, 0.0  ;;  %v1892_v27 = vld [vmem:[%s3347_s5 + $0x18] sm:$0xff] }
 0x497   : > { %v1293_v29 = vmax.f32 %v1290_v28, 0.0  ;;  %v2279_v11 = vpack.c.bf16 %v1892_v27, %v1890_v12 }
 0x499   : > { %1315 = vmatprep.subr.mxu0 %v1293_v29 }
 0x49a   : > { %1316 = vmatpush1.msra.mxu0 %v1292_v31 }
 0x49b   : > { %2086 = vmatmul.mubr.msk.f32.vlgmr.msra.gmra.mrb[2].mxu0 %vm1308_vm3, %v1294_v0  ;;  %2272 = vmatprep.subr.bf16.mxu0 %v2447_v46 }
 0x49c   : > { %1385 = vmatprep.mubr.f32.mxu0 %v2438_v8 }
 0x49f   : > { %2087 = vmatmul.mubr.msk.f32.gmra.mrb[4].mxu0 %vm1308_vm3, %v1295_v2  ;;  %v1889_v2 = vld [vmem:[%s3347_s5] sm:$0xff] }
 0x4a0   : > { %2159 = vmatprep.mubr.msk.f32.mxu0 %vm2448_vm4, %v2438_v8  ;;  %v2281_v41 = vpack.c.bf16 %v1891_v40, %v1889_v2 }
 0x56e   : > { %v1381_v16 = vpop.f32.mrb[2].mxu0 }
 0x56f   : > { %v1383_v33 = vpop.f32.mrb[3].mxu0  ;;  %v3209_v9 = vadd.f32 %v1381_v16, %v1301_v32  ;;  %v1698_v16 = vpop.permute.xlu0 %1697 }
 0x570   : > { %v3207_v42 = vadd.f32 %v1383_v33, %v1301_v32 }
 0x572   : > { %v1387_v1 = vpop.f32.mrb[4].mxu0  ;;  %1488 = vmatprep.mubr.f32.mxu1 %v3207_v42 }
 0x573   : > { %v1389_v43 = vpop.f32.mrb[5].mxu0  ;;  %1489 = vmatmul.mubr.f32.vlgmr.msra.gmra.mrb[4].mxu1 %v3209_v9  ;;  %v3215_v45 = vadd.f32 %v1387_v1, %v1306_v3 }
 0x574   : > { %v3213_v44 = vadd.f32 %v1389_v43, %v1306_v3 }
 0x576   : > { %1493 = vmatprep.mubr.f32.mxu1 %v3213_v44 }
 0x577   : > { %1494 = vmatmul.mubr.f32.gmra.mrb[6].mxu1 %v3215_v45 }
 0x646   : > { %v2140_v47 = vpop.f32.mrb[4].mxu1 }
 0x647   : > { %v2141_v48 = vpop.f32.mrb[5].mxu1 }
 0x648   : > { %v2142_v10 = vadd.f32 %v2141_v48, %v2140_v47 }
 0x64a   : > { %v2143_v49 = vpop.f32.mrb[6].mxu1 }
 0x64b   : > { %v2144_v50 = vpop.f32.mrb[7].mxu1 }
 0x64c   : > { %v2145_v6 = vadd.f32 %v2144_v50, %v2143_v49 }
 0x64e   : > { %v2273_v23 = vpack.c.bf16 %v2145_v6, %v2142_v10 }
 0x650   : > { %2274 = vmatpush3.bf16.msra.mxu0 %v2273_v23 }
 0x653   : > { %2160 = vmatmul.mubr.msk.f32.vlgmr.msra.gmra.mrb[6].mxu0 %vm850_vm0, %v1499_v7 }
 0x654   : > { %2164 = vmatprep.mubr.msk.f32.mxu0 %vm1308_vm3, %v1584_v54 }
 0x726   : > { %v1575_v57 = vpop.f32.mrb[6].mxu0 }
 0x727   : > { %v1576_v58 = vadd.f32 %v1575_v57, %v1504_v55  ;;  %v2161_v34 = vpop.f32.mrb[7].mxu0 }
 0x729   : > { %v1579_v35 = vadd.f32 3.0, %v1576_v58 }
 0x72b   : > { %v1580_v59 = vmax.f32 %v1579_v35, 0.0 }
 0x72d   : > { %v1581_v36 = vmin.f32 %v1580_v59, 6.0 }
 0x72f   : > { %v1582_v60 = vmul.f32 %v1581_v36, %v1576_v58  ;;  %v2361_v36 = vld [vmem:[%s2609_s27] sm:$0xff] }
 0x731   : > { %v1583_v61 = vmul.f32 0.16666667, %v1582_v60 }
 0x733   : > { %1706 = vrot.lane.b32.xlu1 %v1583_v61, %s3420_s23  ;;  %2162 = vmatprep.subr.mxu0 %v1583_v61 }
 0x734   : > { %2163 = vmatpush3.msra.mxu0 %v1583_v61 }
 0x735   : > { %2165 = vmatmul.mubr.msk.f32.vlgmr.msra.gmra.mrb[8].mxu0 %vm1308_vm3, %v1585_v62 }
 0x736   : > { %2169 = vmatprep.mubr.msk.f32.mxu0 %vm1308_vm3, %v1691_v63  ;;  %v2362_v63 = vld [vmem:[%s2609_s27 + $0x8] sm:$0xff] }
 0x737   : > { %1595 = vperm.xlu1 %2344, %v1587_v4  }
 0x73b   : > { %1702 = vperm.xlu1 %2344, %v1694_v53  }
 0x7a5   : > { %v1707_v51 = vpop.permute.xlu1 %1706 }
 0x7a6   : > { %2167 = vmatprep.subr.mxu0 %v1707_v51 }
 0x7a7   : > { %2168 = vmatpush3.msra.mxu0 %v1707_v51 }
 0x7a8   : > { %2170 = vmatmul.mubr.msk.f32.vlgmr.msra.gmra.mrb[10].mxu0 %vm1308_vm3, %v1692_v52  ;;  %2276 = vmatprep.subr.bf16.mxu0 %v2275_v21  ;;  %v2364_v21 = vld [vmem:[%s2609_s27 + $0x18] sm:$0xff] }
 0x7a9   : > { %2278 = vmatpush1.bf16.msra.mxu0 %v2277_v18  ;;  %1876 = vmatprep.mubr.f32.mxu0 %v2438_v8 }
 0x7aa   : > { %2280 = vmatprep.subr.bf16.mxu0 %v2279_v11 }
 0x7b6   : > { %v1596_v19 = vpop.permute.xlu1 %1595 }
 0x7ba   : > { %v1703_v56 = vpop.permute.xlu1 %1702 }
 0x808   : > { %v2166_v17 = vpop.f32.mrb[8].mxu0 }
 0x809   : > { %v1676_v24 = vadd.f32 %v2166_v17, %v1596_v19  ;;  %v1670_v39 = vpop.f32.mrb[9].mxu0 }
 0x80a   : > { %v1671_v38 = vadd.f32 %v1670_v39, %v1591_v22 }
 0x80b   : > { %v2092_v25 = vmul.f32 -1.442695, %v1676_v24 }
 0x80c   : > { %v2091_v26 = vmul.f32 -1.442695, %v1671_v38 }
 0x80d   : > { %2345 = vpow2.f32 %v2092_v25 }
 0x80e   : > { %2347 = vpow2.f32 %v2091_v26 }
 0x817   : > { %v2346_v28 = vpop.eup %2345 }
 0x818   : > { %v2348_v29 = vpop.eup %2347  ;;  %v1686_v0 = vadd.f32 1.0, %v2346_v28 }
 0x819   : > { %v1685_v31 = vadd.f32 1.0, %v2348_v29 }
 0x81b   : > { %2349 = vrcp.f32 %v1685_v31 }
 0x81c   : > { %2351 = vrcp.f32 %v1686_v0 }
 0x825   : > { %v2350_v30 = vpop.eup %2349 }
 0x826   : > { %2097 = vmatmul.mubr.msk.f32.vlgmr.msra.gmra.mrb[12].mxu0 %vm850_vm0, %v2350_v30  ;;  %v2352_v15 = vpop.eup %2351 }
 0x827   : > { %1882 = vmatprep.mubr.f32.mxu0 %v2438_v8  ;;  %2282 = vmatpush1.bf16.msra.mxu0 %v2281_v41 }
 0x82a   : > { %2098 = vmatmul.mubr.msk.f32.gmra.mrb[14].mxu0 %vm850_vm0, %v2352_v15 }
 0x82b   : > { %1963 = vmatprep.mubr.f32.mxu0 %v2438_v8 }
 0x87b   : > { %v2171_v37 = vpop.f32.mrb[10].mxu0 }
 0x87c   : > { %v1787_v32 = vadd.f32 %v2171_v37, %v1703_v56  ;;  %v1781_v33 = vpop.f32.mrb[11].mxu0 }
 0x87d   : > { %v1782_v1 = vadd.f32 %v1781_v33, %v1698_v16 }
 0x87e   : > { %v2096_v3 = vmul.f32 -1.442695, %v1787_v32 }
 0x87f   : > { %v2095_v43 = vmul.f32 -1.442695, %v1782_v1 }
 0x880   : > { %2353 = vpow2.f32 %v2096_v3 }
 0x881   : > { %2355 = vpow2.f32 %v2095_v43 }
 0x88a   : > { %v2354_v46 = vpop.eup %2353 }
 0x88b   : > { %v2356_v47 = vpop.eup %2355  ;;  %v1797_v10 = vadd.f32 1.0, %v2354_v46 }
 0x88c   : > { %v1796_v48 = vadd.f32 1.0, %v2356_v47 }
 0x88e   : > { %2357 = vrcp.f32 %v1796_v48 }
 0x88f   : > { %2359 = vrcp.f32 %v1797_v10 }
 0x898   : > { %v2358_v49 = vpop.eup %2357 }
 0x899   : > { %2099 = vmatmul.mubr.msk.f32.vlgmr.msra.gmra.mrb[16].mxu0 %vm850_vm0, %v2358_v49  ;;  %v2360_v50 = vpop.eup %2359 }
 0x89a   : > { %1969 = vmatprep.mubr.f32.mxu0 %v2438_v8 }
 0x89d   : > { %2100 = vmatmul.mubr.msk.f32.gmra.mrb[18].mxu0 %vm850_vm0, %v2360_v50 }
 0x8f9   : > { %v1878_v6 = vpop.f32.mrb[12].mxu0 }
 0x8fa   : > { %v1880_v23 = vpop.f32.mrb[13].mxu0 }
 0x8fd   : > { %v1884_v7 = vpop.f32.mrb[14].mxu0 }
 0x8fe   : > { %v1886_v54 = vpop.f32.mrb[15].mxu0 }
 0x96c   : > { %v1965_v55 = vpop.f32.mrb[16].mxu0 }
 0x96d   : > { %v1976_v57 = vmul.f32 %v1965_v55, %v1878_v6  ;;  %v1967_v58 = vpop.f32.mrb[17].mxu0 }
 0x96e   : > { %v1977_v34 = vmul.f32 %v1967_v58, %v1880_v23 }
 0x96f   : > { %v1980_v35 = vmul.f32 %v1976_v57, %v3209_v9 }
 0x970   : > { %v1981_v8 = vmul.f32 %v1977_v34, %v3207_v42  ;;  %v1971_v59 = vpop.f32.mrb[18].mxu0  ;;  %v2363_v42 = vld [vmem:[%s2609_s27 + $0x10] sm:$0xff]  ;;  %s2449_s27 = smov [#allocation2]  }
 0x971   : > { %v1984_v60 = vadd.f32 %v2361_v36, %v1980_v35  ;;  %v1978_v61 = vmul.f32 %v1971_v59, %v1884_v7  ;;  %v1973_v62 = vpop.f32.mrb[19].mxu0  ;;  %s2369_s6 = sshll.u32 %s2449_s27, 4  ;;  %s2370_s6 = int_to_ptr.vmem [resolvable:$false] %s2369_s6 }
 0x972   : > { %v1985_v4 = vadd.f32 %v2362_v63, %v1981_v8  ;;  %v1979_v53 = vmul.f32 %v1973_v62, %v1886_v54  ;;  %s2371_s26 = scalar_lea.vmem %s2370_s6, 1024  ;;  %p2372_p0 = scmp.lt.s32.totalorder %s3296_s28, %s2370_s6 }
 0x973   : > { %v1988_v5 = vmax.f32 %v1984_v60, 0.0  ;;  %v1982_v13 = vmul.f32 %v1978_v61, %v3215_v45  ;;  %p2373_p1 = scmp.lt.s32.totalorder %s2371_s26, %s2365_s21 }
 0x974   : > { %v1989_v14 = vmax.f32 %v1985_v4, 0.0  ;;  %v1983_v20 = vmul.f32 %v1979_v53, %v3213_v44 }
 0x975   : > { %1992 = vst [vmem:[%s622_s11] sm:$0xff] %v1988_v5  ;;  %v1986_v9 = vadd.f32 %v2363_v42, %v1982_v13  ;;  %p2374_p2 = por %p2373_p1, %p2372_p0 }
 0x976   : > { %1993 = vst [vmem:[%s622_s11 + $0x8] sm:$0xff] %v1989_v14  ;;  %v1987_v51 = vadd.f32 %v2364_v21, %v1983_v20 }
 0x977   : > { %v1990_v52 = vmax.f32 %v1986_v9, 0.0  ;;  %p2375_p3 = pnand %p2374_p2, %p2368_p13 }
 0x978   : > { %v1991_v45 = vmax.f32 %v1987_v51, 0.0 }
 0x979   : > { %1994 = vst [vmem:[%s622_s11 + $0x10] sm:$0xff] %v1990_v52 }
 0x97a   : > { %1995 = vst [vmem:[%s622_s11 + $0x18] sm:$0xff] %v1991_v45 }
 0x97b   : > { %2378 = shalt.err (!%p2375_p3)
}
 0x97c   : > { %s2379_s9 = scalar_lea.hbm %s3294_s25, 512  ;;  %s2383_s23 = scalar_lea.hbm %s3362_s20, 1024 }
 0x97d   : > { %p2380_p4 = scmp.ne.s32.totalorder %s3294_s25, %s2379_s9  ;;  %p2384_p9 = scmp.lt.u32.totalorder %s3294_s25, %s3362_s20 }
 0x97e   : > { %p2385_p10 = scmp.lt.u32.totalorder %s2383_s23, %s2379_s9  ;;  %p2387_p12 = scmp.lt.u32.totalorder %s2379_s9, %s3294_s25 }
 0x97f   : > { %p2381_p7 = pnand %p2380_p4, %p2594_p5 }
 0x980   : > { %p2386_p11 = por %p2385_p10, %p2384_p9 }
 0x981   : > { %p2382_p8 = pneg %p2381_p7 }
 0x982   : > { %p2388_p13 = por %p2387_p12, %p2386_p11 }
 0x984   : > { %p2389_p0 = pnand %p2388_p13, %p2382_p8 }
 0x986   : > { %2392 = shalt.err (!%p2389_p0)
}
 0x987   : > { %s2450_s21 = smov 256   ;;  %s3422_s6 = smov 16  }
 0x988   : > { %2283 = dma.vmem_to_hbm [thread:$0]  (%p2594_p5), %s3296_s28, 512, %s3294_s25, %s3300_s2, %s2450_s21, %s2450_s21, %s3422_s6  }
 0x989 PF: > { %p2289_p1 = scmp.ge.s32.totalorder %s2427_s24, 2  ;;  %s2025_s26 = sand.u32 1, %s2415_s1  }
 0x98a   : > { %s2026_s9 = scalar_lea.sflag [#allocation3], %s2025_s26 }
 0x98b   : > { %p2286_p2 = pnand %p2289_p1, %p2598_p6 }
 0x98d   : > { %2410 = dma.done.wait (!%p2286_p2), %s2026_s9, 512  }
 0x98e   : > { %2412 = vsyncadd (!%p2286_p2), %s2026_s9, 4294966784  ;;  %s3423_s0 = sld [smem:[#allocation5_spill]]  ;;  %s3424_s23 = sld [smem:[#allocation6_spill]] }
 0x98f   : > { %p30_p3 = scmp.ge.s32.totalorder %s2581_s3, 4   ;;  %s3425_s1 = smov %s2419_s22 }
 0x990   : > { %s3427_s24 = smov %s2581_s3 }
 0x991   :  { %32 = sbr.rel (!%p30_p3) target bundleno = 15 (0xf), region = 135 }
 0x994   : > { %s3426_s22 = smov %s3423_s0 }
 0x998   :  { %2031 = vsyncpa [#allocation3], 1 }
 0x999   :  { %2033 = vsyncpa [#allocation3 + $0x1], 1 }

</bundles_post_ra>
